<compile_context>
chip_gen: v6e
topology: v6e:2x2x1
jax: 0.10.0
libtpu: 0.0.40
codegen_flags: <defaults>
</compile_context>

<pallas_src>
import numpy as np
import jax
import jax.numpy as jnp
from jax.experimental import pallas as pl
from jax.experimental.pallas import tpu as pltpu


def _gnn_kernel(node_ref, edge_ref, w1_ref, b1_ref, w2_ref, b2_ref, out_ref):
    # node_ref : (G, N, D_IN), edge_ref : (G, 2, E), out_ref : (G, D_OUT)
    x = node_ref[...].astype(jnp.float32)                    # (G, N, D_IN)
    G, N, D = x.shape
    edges = edge_ref[...]                                    # (G, 2, E) int32
    E = edges.shape[-1]

    # valid node <=> every feature element != -100 (matches torch reference)
    valid = jnp.min(jnp.where(x != -100.0, 1.0, 0.0), axis=-1, keepdims=True)  # (G, N, 1)
    x = x * valid                                            # zero padded rows

    # ---- adjacency from edge list via one-hot matmuls (MXU, bf16 exact) ----
    src = edges[:, 0:1, :]                                   # (G, 1, E)
    dst = edges[:, 1:2, :]                                   # (G, 1, E)
    edge_valid = jnp.logical_and(src >= 0, dst >= 0)         # (G, 1, E)
    node_ids = jax.lax.broadcasted_iota(jnp.int32, (G, N, E), 1)
    src_oh = jnp.where(jnp.logical_and(node_ids == src, edge_valid),
                       1.0, 0.0).astype(jnp.bfloat16)        # (G, N, E)
    dst_oh = jnp.where(jnp.logical_and(node_ids == dst, edge_valid),
                       1.0, 0.0).astype(jnp.bfloat16)        # (G, N, E)

    # A[g, d, s] = #edges s -> d  (small integer counts; exact in bf16/f32)
    A = jnp.einsum('gne,gme->gnm', dst_oh, src_oh,
                   preferred_element_type=jnp.float32)       # (G, N, N)

    # degree including the implicit self-loop on valid nodes
    deg = jnp.sum(A, axis=-1, keepdims=True) + valid         # (G, N, 1)
    inv_deg = 1.0 / jnp.maximum(deg, 1.0)
    A16 = A.astype(jnp.bfloat16)

    w1 = w1_ref[...].astype(jnp.bfloat16)
    w2 = w2_ref[...].astype(jnp.bfloat16)

    # ---- layer 1: one big (G*N, D) @ (D, H) matmul --------------------------
    h = jnp.dot(x.reshape(G * N, D).astype(jnp.bfloat16), w1,
                preferred_element_type=jnp.float32).reshape(G, N, -1)
    msg = jnp.einsum('gnm,gmh->gnh', A16, h.astype(jnp.bfloat16),
                     preferred_element_type=jnp.float32)
    h = (msg + h * valid) * inv_deg + b1_ref[...]            # mean agg + self loop
    h = jnp.maximum(h, 0.0)

    # ---- layer 2 -------------------------------------------------------------
    Hd = h.shape[-1]
    o = jnp.dot(h.reshape(G * N, Hd).astype(jnp.bfloat16), w2,
                preferred_element_type=jnp.float32).reshape(G, N, -1)
    msg2 = jnp.einsum('gnm,gmh->gnh', A16, o.astype(jnp.bfloat16),
                      preferred_element_type=jnp.float32)
    o = (msg2 + o * valid) * inv_deg + b2_ref[...]

    # ---- masked mean pool (torch.mean over the unpadded nodes) --------------
    o = o * valid
    n_valid = jnp.maximum(jnp.sum(valid, axis=1), 1.0)       # (G, 1)
    pooled = jnp.sum(o, axis=1) / n_valid                    # (G, D_OUT)
    out_ref[...] = pooled.astype(out_ref.dtype)


def graph_feature_extractor(node_features, edge_indices,
                            node_features_shape, edge_indices_shape, params,
                            graphs_per_step=8):
    """JAX/Pallas equivalent of GraphFeatureExtractor.forward."""
    nfs = np.asarray(node_features_shape)
    max_idx = int(np.argmax(nfs[:, 0] * nfs[:, 1]))
    max_n, d_in = int(nfs[max_idx, 0]), int(nfs[max_idx, 1])

    node_features = jnp.reshape(node_features, (-1, max_n, d_in)).astype(jnp.float32)
    B = node_features.shape[0]
    edge_indices = jnp.reshape(edge_indices, (B, 2, -1)).astype(jnp.int32)
    max_e = edge_indices.shape[-1]

    w1, b1, w2, b2 = params
    H = w1.shape[1]
    d_out = w2.shape[1]

    # Pad the batch to a multiple of G with fully-padded (empty) graphs so a
    # whole (G, ...) block is processed per grid step.  Empty graphs pool to 0
    # and are sliced off below.
    G = int(graphs_per_step)
    B_pad = ((B + G - 1) // G) * G
    if B_pad != B:
        node_features = jnp.concatenate(
            [node_features,
             jnp.full((B_pad - B, max_n, d_in), -100.0, jnp.float32)], axis=0)
        edge_indices = jnp.concatenate(
            [edge_indices,
             jnp.full((B_pad - B, 2, max_e), -100, jnp.int32)], axis=0)

    out = pl.pallas_call(
        _gnn_kernel,
        out_shape=jax.ShapeDtypeStruct((B_pad, d_out), jnp.float32),
        grid=(B_pad // G,),
        in_specs=[
            pl.BlockSpec((G, max_n, d_in), lambda b: (b, 0, 0)),
            pl.BlockSpec((G, 2, max_e), lambda b: (b, 0, 0)),
            pl.BlockSpec((d_in, H), lambda b: (0, 0)),
            pl.BlockSpec((1, H), lambda b: (0, 0)),
            pl.BlockSpec((H, d_out), lambda b: (0, 0)),
            pl.BlockSpec((1, d_out), lambda b: (0, 0)),
        ],
        out_specs=pl.BlockSpec((G, d_out), lambda b: (b, 0)),
        compiler_params=pltpu.CompilerParams(
            dimension_semantics=("parallel",)),
    )(node_features, edge_indices, w1, b1, w2, b2)

    return out[:B]                                           # (B, D_OUT)


def init_params(key, d_in, hidden, d_out):
    k1, k2 = jax.random.split(key)
    w1 = 0.1 * jax.random.normal(k1, (d_in, hidden), jnp.float32)
    b1 = jnp.zeros((1, hidden), jnp.float32)
    w2 = 0.1 * jax.random.normal(k2, (hidden, d_out), jnp.float32)
    b2 = jnp.zeros((1, d_out), jnp.float32)
    return (w1, b1, w2, b2)


def _reference_np(nf, ei, params):
    """Pure-numpy per-graph reference (mirrors the torch module's semantics)."""
    w1, b1, w2, b2 = [np.asarray(p, np.float32) for p in params]
    nf = np.asarray(nf, np.float32)
    ei = np.asarray(ei)
    B = nf.shape[0]
    outs = np.zeros((B, w2.shape[1]), np.float32)
    for b in range(B):
        x = nf[b]
        valid = np.all(x != -100.0, axis=-1)
        xv = x[valid]
        n = xv.shape[0]
        A = np.zeros((n, n), np.float32)
        for s, d in zip(ei[b, 0], ei[b, 1]):
            if s >= 0 and d >= 0:
                A[int(d), int(s)] += 1.0
        A = A + np.eye(n, dtype=np.float32)
        A = A / np.maximum(A.sum(-1, keepdims=True), 1.0)
        h = np.maximum(A @ (xv @ w1) + b1, 0.0)
        o = A @ (h @ w2) + b2
        outs[b] = o.mean(axis=0)
    return outs


if __name__ == "__main__":
    key = jax.random.PRNGKey(0)
    B, MAX_N, D_IN = 2, 16, 8
    HIDDEN, D_OUT = 16, 32
    MAX_E = 32

    k_nodes, k_params = jax.random.split(key, 2)

    # node features with trailing rows padded to -100
    nf = np.array(jax.random.normal(k_nodes, (B, MAX_N, D_IN), jnp.float32))  # writable copy
    n_valid_nodes = [10, 16]
    for b in range(B):
        nf[b, n_valid_nodes[b]:, :] = -100.0
    node_features = jnp.asarray(nf)

    # edge indices (2, MAX_E) per graph, padded with -100
    n_valid_edges = [12, 20]
    ei = np.full((B, 2, MAX_E), -100, dtype=np.int32)
    rng = np.random.RandomState(0)
    for b in range(B):
        e = n_valid_edges[b]
        ei[b, 0, :e] = rng.randint(0, n_valid_nodes[b], size=e)
        ei[b, 1, :e] = rng.randint(0, n_valid_nodes[b], size=e)
    edge_indices = jnp.asarray(ei)

    node_features_shape = jnp.array([[MAX_N, D_IN]] * B, jnp.int32)
    edge_indices_shape = jnp.array([[2, n] for n in n_valid_edges], jnp.int32)

    params = init_params(k_params, D_IN, HIDDEN, D_OUT)

    out = graph_feature_extractor(node_features, edge_indices,
                                  node_features_shape, edge_indices_shape,
                                  params)
    out = jax.block_until_ready(out)
    assert out.shape == (B, D_OUT), out.shape

    ref = _reference_np(nf, ei, params)
    np.testing.assert_allclose(np.asarray(out), ref, rtol=3e-2, atol=3e-2)

    print("KERNEL_OK")
</pallas_src>

<mosaic_0001>
module attributes {stable_mosaic.version = 11 : i64} {
  func.func @_gnn_kernel(%arg0: i32, %arg1: memref<8x16x8xf32, #tpu.memory_space<vmem>>, %arg2: memref<8x2x32xi32, #tpu.memory_space<vmem>>, %arg3: memref<8x16xf32, #tpu.memory_space<vmem>>, %arg4: memref<1x16xf32, #tpu.memory_space<vmem>>, %arg5: memref<16x32xf32, #tpu.memory_space<vmem>>, %arg6: memref<1x32xf32, #tpu.memory_space<vmem>>, %arg7: memref<8x32xf32, #tpu.memory_space<vmem>>) attributes {dimension_semantics = [#tpu.dimension_semantics<parallel>], iteration_bounds = array<i64: 1>, scalar_prefetch = 0 : i64, scratch_operands = 0 : i64, tpu.core_type = #tpu.core_type<tc>, window_params = [{transform_indices = @transform_0, window_bounds = array<i64: 8, 16, 8>}, {transform_indices = @transform_1, window_bounds = array<i64: 8, 2, 32>}, {pipeline_mode = #tpu.pipeline_mode<synchronous>, transform_indices = @transform_2, window_bounds = array<i64: 8, 16>}, {pipeline_mode = #tpu.pipeline_mode<synchronous>, transform_indices = @transform_3, window_bounds = array<i64: 1, 16>}, {pipeline_mode = #tpu.pipeline_mode<synchronous>, transform_indices = @transform_4, window_bounds = array<i64: 16, 32>}, {pipeline_mode = #tpu.pipeline_mode<synchronous>, transform_indices = @transform_5, window_bounds = array<i64: 1, 32>}, {transform_indices = @transform_6, window_bounds = array<i64: 8, 32>}]} {
    %c0 = arith.constant 0 : index
    %c0_0 = arith.constant 0 : index
    %c0_1 = arith.constant 0 : index
    %0 = vector.load %arg1[%c0, %c0_0, %c0_1] : memref<8x16x8xf32, #tpu.memory_space<vmem>>, vector<8x16x8xf32>
    %c0_2 = arith.constant 0 : index
    %c0_3 = arith.constant 0 : index
    %c0_4 = arith.constant 0 : index
    %1 = vector.load %arg2[%c0_2, %c0_3, %c0_4] : memref<8x2x32xi32, #tpu.memory_space<vmem>>, vector<8x2x32xi32>
    %cst = arith.constant -1.000000e+02 : f32
    %2 = vector.broadcast %cst : f32 to vector<8x16x8xf32>
    %3 = arith.cmpf one, %0, %2 : vector<8x16x8xf32>
    %cst_5 = arith.constant 1.000000e+00 : f32
    %cst_6 = arith.constant 0.000000e+00 : f32
    %4 = vector.broadcast %cst_5 : f32 to vector<8x16x8xf32>
    %5 = vector.broadcast %cst_6 : f32 to vector<8x16x8xf32>
    %6 = arith.select %3, %4, %5 : vector<8x16x8xi1>, vector<8x16x8xf32>
    %cst_7 = arith.constant dense<0x7F800000> : vector<8x16xf32>
    %7 = vector.multi_reduction <minimumf>, %6, %cst_7 [2] : vector<8x16x8xf32> to vector<8x16xf32>
    %8 = vector.shape_cast %7 : vector<8x16xf32> to vector<8x16x1xf32>
    %9 = vector.broadcast %8 : vector<8x16x1xf32> to vector<8x16x8xf32>
    %10 = arith.mulf %0, %9 : vector<8x16x8xf32>
    %11 = vector.extract_strided_slice %1 {offsets = [0, 0, 0], sizes = [8, 1, 32], strides = [1, 1, 1]} : vector<8x2x32xi32> to vector<8x1x32xi32>
    %12 = vector.extract_strided_slice %1 {offsets = [0, 1, 0], sizes = [8, 1, 32], strides = [1, 1, 1]} : vector<8x2x32xi32> to vector<8x1x32xi32>
    %c0_i32 = arith.constant 0 : i32
    %13 = vector.broadcast %c0_i32 : i32 to vector<8x1x32xi32>
    %14 = arith.cmpi sge, %11, %13 : vector<8x1x32xi32>
    %c0_i32_8 = arith.constant 0 : i32
    %15 = vector.broadcast %c0_i32_8 : i32 to vector<8x1x32xi32>
    %16 = arith.cmpi sge, %12, %15 : vector<8x1x32xi32>
    %17 = arith.andi %14, %16 : vector<8x1x32xi1>
    %18 = tpu.iota {dimensions = array<i32: 1>} : vector<8x16x32xi32>
    %19 = vector.broadcast %11 : vector<8x1x32xi32> to vector<8x16x32xi32>
    %20 = arith.cmpi eq, %18, %19 : vector<8x16x32xi32>
    %21 = vector.broadcast %17 : vector<8x1x32xi1> to vector<8x16x32xi1>
    %22 = arith.andi %20, %21 : vector<8x16x32xi1>
    %cst_9 = arith.constant 1.000000e+00 : f32
    %cst_10 = arith.constant 0.000000e+00 : f32
    %23 = vector.broadcast %cst_9 : f32 to vector<8x16x32xf32>
    %24 = vector.broadcast %cst_10 : f32 to vector<8x16x32xf32>
    %25 = arith.select %22, %23, %24 : vector<8x16x32xi1>, vector<8x16x32xf32>
    %26 = arith.truncf %25 : vector<8x16x32xf32> to vector<8x16x32xbf16>
    %27 = vector.broadcast %12 : vector<8x1x32xi32> to vector<8x16x32xi32>
    %28 = arith.cmpi eq, %18, %27 : vector<8x16x32xi32>
    %29 = vector.broadcast %17 : vector<8x1x32xi1> to vector<8x16x32xi1>
    %30 = arith.andi %28, %29 : vector<8x16x32xi1>
    %cst_11 = arith.constant 1.000000e+00 : f32
    %cst_12 = arith.constant 0.000000e+00 : f32
    %31 = vector.broadcast %cst_11 : f32 to vector<8x16x32xf32>
    %32 = vector.broadcast %cst_12 : f32 to vector<8x16x32xf32>
    %33 = arith.select %30, %31, %32 : vector<8x16x32xi1>, vector<8x16x32xf32>
    %34 = arith.truncf %33 : vector<8x16x32xf32> to vector<8x16x32xbf16>
    "tpu.trace_start"() <{level = 10 : i32, message = "gne,gme->gnm"}> : () -> ()
    %cst_13 = arith.constant dense<0.000000e+00> : vector<8x16x16xf32>
    %35 = tpu.matmul %34, %26, %cst_13 {dimension_numbers = #tpu.dot_dimension_numbers<[2], [2], [1], [1], [0, 0, 0, 1, 1, 1], [0], [0]>} : vector<8x16x32xbf16>, vector<8x16x32xbf16>, vector<8x16x16xf32> -> vector<8x16x16xf32>
    "tpu.trace_stop"() : () -> ()
    %cst_14 = arith.constant dense<0.000000e+00> : vector<8x16xf32>
    %36 = vector.multi_reduction <add>, %35, %cst_14 [2] : vector<8x16x16xf32> to vector<8x16xf32>
    %37 = vector.shape_cast %36 : vector<8x16xf32> to vector<8x16x1xf32>
    %38 = arith.addf %37, %8 : vector<8x16x1xf32>
    %cst_15 = arith.constant 1.000000e+00 : f32
    %39 = vector.broadcast %cst_15 : f32 to vector<8x16x1xf32>
    %40 = arith.maximumf %38, %39 : vector<8x16x1xf32>
    %cst_16 = arith.constant 1.000000e+00 : f32
    %41 = vector.broadcast %cst_16 : f32 to vector<8x16x1xf32>
    %42 = arith.divf %41, %40 : vector<8x16x1xf32>
    %43 = arith.truncf %35 : vector<8x16x16xf32> to vector<8x16x16xbf16>
    %c0_17 = arith.constant 0 : index
    %c0_18 = arith.constant 0 : index
    %44 = vector.load %arg3[%c0_17, %c0_18] : memref<8x16xf32, #tpu.memory_space<vmem>>, vector<8x16xf32>
    %45 = arith.truncf %44 : vector<8x16xf32> to vector<8x16xbf16>
    %c0_19 = arith.constant 0 : index
    %c0_20 = arith.constant 0 : index
    %46 = vector.load %arg5[%c0_19, %c0_20] : memref<16x32xf32, #tpu.memory_space<vmem>>, vector<16x32xf32>
    %47 = arith.truncf %46 : vector<16x32xf32> to vector<16x32xbf16>
    %48 = vector.shape_cast %10 : vector<8x16x8xf32> to vector<128x8xf32>
    %49 = arith.truncf %48 : vector<128x8xf32> to vector<128x8xbf16>
    %cst_21 = arith.constant dense<0.000000e+00> : vector<128x16xf32>
    %50 = tpu.matmul %49, %45, %cst_21 {dimension_numbers = #tpu.dot_dimension_numbers<[1], [0], [0], [1], [0, 0, 1, 1], [], []>} : vector<128x8xbf16>, vector<8x16xbf16>, vector<128x16xf32> -> vector<128x16xf32>
    %51 = vector.shape_cast %50 : vector<128x16xf32> to vector<8x16x16xf32>
    %52 = arith.truncf %51 : vector<8x16x16xf32> to vector<8x16x16xbf16>
    "tpu.trace_start"() <{level = 10 : i32, message = "gnm,gmh->gnh"}> : () -> ()
    %cst_22 = arith.constant dense<0.000000e+00> : vector<8x16x16xf32>
    %53 = tpu.matmul %43, %52, %cst_22 {dimension_numbers = #tpu.dot_dimension_numbers<[2], [1], [1], [2], [0, 0, 0, 1, 1, 2], [0], [0]>} : vector<8x16x16xbf16>, vector<8x16x16xbf16>, vector<8x16x16xf32> -> vector<8x16x16xf32>
    "tpu.trace_stop"() : () -> ()
    %54 = vector.broadcast %8 : vector<8x16x1xf32> to vector<8x16x16xf32>
    %55 = arith.mulf %51, %54 : vector<8x16x16xf32>
    %56 = arith.addf %53, %55 : vector<8x16x16xf32>
    %57 = vector.broadcast %42 : vector<8x16x1xf32> to vector<8x16x16xf32>
    %58 = arith.mulf %56, %57 : vector<8x16x16xf32>
    %c0_23 = arith.constant 0 : index
    %c0_24 = arith.constant 0 : index
    %59 = vector.load %arg4[%c0_23, %c0_24] : memref<1x16xf32, #tpu.memory_space<vmem>>, vector<1x16xf32>
    %60 = vector.shape_cast %59 : vector<1x16xf32> to vector<1x1x16xf32>
    %61 = vector.broadcast %60 : vector<1x1x16xf32> to vector<8x16x16xf32>
    %62 = arith.addf %58, %61 : vector<8x16x16xf32>
    %cst_25 = arith.constant 0.000000e+00 : f32
    %63 = vector.broadcast %cst_25 : f32 to vector<8x16x16xf32>
    %64 = arith.maximumf %62, %63 : vector<8x16x16xf32>
    %65 = vector.shape_cast %64 : vector<8x16x16xf32> to vector<128x16xf32>
    %66 = arith.truncf %65 : vector<128x16xf32> to vector<128x16xbf16>
    %cst_26 = arith.constant dense<0.000000e+00> : vector<128x32xf32>
    %67 = tpu.matmul %66, %47, %cst_26 {dimension_numbers = #tpu.dot_dimension_numbers<[1], [0], [0], [1], [0, 0, 1, 1], [], []>} : vector<128x16xbf16>, vector<16x32xbf16>, vector<128x32xf32> -> vector<128x32xf32>
    %68 = vector.shape_cast %67 : vector<128x32xf32> to vector<8x16x32xf32>
    %69 = arith.truncf %68 : vector<8x16x32xf32> to vector<8x16x32xbf16>
    "tpu.trace_start"() <{level = 10 : i32, message = "gnm,gmh->gnh"}> : () -> ()
    %cst_27 = arith.constant dense<0.000000e+00> : vector<8x16x32xf32>
    %70 = tpu.matmul %43, %69, %cst_27 {dimension_numbers = #tpu.dot_dimension_numbers<[2], [1], [1], [2], [0, 0, 0, 1, 1, 2], [0], [0]>} : vector<8x16x16xbf16>, vector<8x16x32xbf16>, vector<8x16x32xf32> -> vector<8x16x32xf32>
    "tpu.trace_stop"() : () -> ()
    %71 = vector.broadcast %8 : vector<8x16x1xf32> to vector<8x16x32xf32>
    %72 = arith.mulf %68, %71 : vector<8x16x32xf32>
    %73 = arith.addf %70, %72 : vector<8x16x32xf32>
    %74 = vector.broadcast %42 : vector<8x16x1xf32> to vector<8x16x32xf32>
    %75 = arith.mulf %73, %74 : vector<8x16x32xf32>
    %c0_28 = arith.constant 0 : index
    %c0_29 = arith.constant 0 : index
    %76 = vector.load %arg6[%c0_28, %c0_29] : memref<1x32xf32, #tpu.memory_space<vmem>>, vector<1x32xf32>
    %77 = vector.shape_cast %76 : vector<1x32xf32> to vector<1x1x32xf32>
    %78 = vector.broadcast %77 : vector<1x1x32xf32> to vector<8x16x32xf32>
    %79 = arith.addf %75, %78 : vector<8x16x32xf32>
    %80 = vector.broadcast %8 : vector<8x16x1xf32> to vector<8x16x32xf32>
    %81 = arith.mulf %79, %80 : vector<8x16x32xf32>
    %cst_30 = arith.constant dense<0.000000e+00> : vector<8x1xf32>
    %82 = vector.multi_reduction <add>, %8, %cst_30 [1] : vector<8x16x1xf32> to vector<8x1xf32>
    %cst_31 = arith.constant 1.000000e+00 : f32
    %83 = vector.broadcast %cst_31 : f32 to vector<8x1xf32>
    %84 = arith.maximumf %82, %83 : vector<8x1xf32>
    %cst_32 = arith.constant dense<0.000000e+00> : vector<8x32xf32>
    %85 = vector.multi_reduction <add>, %81, %cst_32 [1] : vector<8x16x32xf32> to vector<8x32xf32>
    %86 = vector.broadcast %84 : vector<8x1xf32> to vector<8x32xf32>
    %87 = arith.divf %85, %86 : vector<8x32xf32>
    %c0_33 = arith.constant 0 : index
    %c0_34 = arith.constant 0 : index
    %88 = vector.load %arg7[%c0_33, %c0_34] : memref<8x32xf32, #tpu.memory_space<vmem>>, vector<8x32xf32>
    tpu.vector_store %arg7[%c0_33, %c0_34], %87 {strides = array<i32>} : memref<8x32xf32, #tpu.memory_space<vmem>>, vector<8x32xf32>,
    return
  }
  func.func @transform_0(%arg0: i32) -> (i32, i32, i32) {
    %c0_i32 = arith.constant 0 : i32
    %c0_i32_0 = arith.constant 0 : i32
    %c0_i32_1 = arith.constant 0 : i32
    return %arg0, %c0_i32, %c0_i32_0 : i32, i32, i32
  }
  func.func @transform_1(%arg0: i32) -> (i32, i32, i32) {
    %c0_i32 = arith.constant 0 : i32
    %c0_i32_0 = arith.constant 0 : i32
    %c0_i32_1 = arith.constant 0 : i32
    return %arg0, %c0_i32, %c0_i32_0 : i32, i32, i32
  }
  func.func @transform_2(%arg0: i32) -> (i32, i32) {
    %c0_i32 = arith.constant 0 : i32
    %c0_i32_0 = arith.constant 0 : i32
    %c0_i32_1 = arith.constant 0 : i32
    return %c0_i32, %c0_i32_0 : i32, i32
  }
  func.func @transform_3(%arg0: i32) -> (i32, i32) {
    %c0_i32 = arith.constant 0 : i32
    %c0_i32_0 = arith.constant 0 : i32
    %c0_i32_1 = arith.constant 0 : i32
    return %c0_i32, %c0_i32_0 : i32, i32
  }
  func.func @transform_4(%arg0: i32) -> (i32, i32) {
    %c0_i32 = arith.constant 0 : i32
    %c0_i32_0 = arith.constant 0 : i32
    %c0_i32_1 = arith.constant 0 : i32
    return %c0_i32, %c0_i32_0 : i32, i32
  }
  func.func @transform_5(%arg0: i32) -> (i32, i32) {
    %c0_i32 = arith.constant 0 : i32
    %c0_i32_0 = arith.constant 0 : i32
    %c0_i32_1 = arith.constant 0 : i32
    return %c0_i32, %c0_i32_0 : i32, i32
  }
  func.func @transform_6(%arg0: i32) -> (i32, i32) {
    %c0_i32 = arith.constant 0 : i32
    %c0_i32_0 = arith.constant 0 : i32
    return %arg0, %c0_i32 : i32, i32
  }
}

</mosaic_0001>

<bundles_post_ra>
// kernel: tpu_custom_call.1
= control target key start
LH: loop header
LB: loop body
LE: loop exit
PB: predicated region body
PF: predicated region fallthrough
CT: control target
= control target key end

     0   :  { %vm81_vm0 = vcmask 64512   ;;  %v3665_v6 = vmov 0.0   ;;  %v186_v7 = vlaneseq  ;;  %v2570_v21 = vmov 0   ;;  %s3658_s0 = inlined_call_operand.vmem [shape: f32[8,16,8], index: 0, kind: input, shape index: {}]   ;;  %s3659_s1 = inlined_call_operand.vmem [shape: s32[8,2,32], index: 1, kind: input, shape index: {}]   ;;  %s3660_s2 = inlined_call_operand.vmem [shape: f32[8,16], index: 2, kind: input, shape index: {}]   ;;  %s3661_s3 = inlined_call_operand.vmem [shape: f32[1,16], index: 3, kind: input, shape index: {}]   ;;  %s3662_s4 = inlined_call_operand.vmem [shape: f32[16,32], index: 4, kind: input, shape index: {}]   ;;  %s3663_s5 = inlined_call_operand.vmem [shape: f32[1,32], index: 5, kind: input, shape index: {}]   ;;  %s3664_s6 = inlined_call_operand.hbm [shape: f32[8,32], index: 6, kind: output, shape index: {}]  }
   0x1   :  { %v2611_v0 = vld [vmem:[%s3658_s0 + $0x10] sm:$0xff]  ;;  %v2616_v1 = vld [vmem:[%s3658_s0] sm:$0xff]  ;;  %v2621_v2 = vld [vmem:[%s3658_s0 + $0x18] sm:$0xff]  ;;  %2314 = vmatprep.subr.bf16.mxu0 %v3665_v6  ;;  %2320 = vmatprep.subr.bf16.mxu1 %v3665_v6  ;;  %vm413_vm13 = vcmask 261120  }
   0x2   :  { %vm51_vm1 = vcmp.ne.f32.partialorder %v2611_v0, -100.0  ;;  %vm49_vm2 = vcmp.ne.f32.partialorder %v2616_v1, -100.0  ;;  %vm52_vm3 = vcmp.ne.f32.partialorder %v2621_v2, -100.0  ;;  %v2629_v3 = vld [vmem:[%s3658_s0 + $0x8] sm:$0xff]  ;;  %v2639_v5 = vld [vmem:[%s3658_s0 + $0x20] sm:$0xff]  ;;  %v2660_v17 = vld [vmem:[%s3658_s0 + $0x38] sm:$0xff] }
   0x3   :  { %v2634_v4 = vld [vmem:[%s3658_s0 + $0x28] sm:$0xff]  ;;  %v67_v8 = vsel %vm51_vm1, 1.0, %v3665_v6  ;;  %v65_v9 = vsel %vm49_vm2, 1.0, %v3665_v6  ;;  %v68_v10 = vsel %vm52_vm3, 1.0, %v3665_v6  ;;  %vm50_vm4 = vcmp.ne.f32.partialorder %v2629_v3, -100.0  ;;  %v2665_v18 = vld [vmem:[%s3658_s0 + $0x30] sm:$0xff] }
   0x4   :  { %v41_v11 = vld [vmem:[%s3659_s1] sm:$0x3]  ;;  %v88_v12 = vsel %vm81_vm0, %v67_v8, inf  ;;  %v82_v13 = vsel %vm81_vm0, %v65_v9, inf  ;;  %v91_v14 = vsel %vm81_vm0, %v68_v10, inf  ;;  %v66_v15 = vsel %vm50_vm4, 1.0, %v3665_v6 }
   0x5   :  { %89 = vmin.xlane.f32.xlu1 %v88_v12  ;;  %83 = vmin.xlane.f32.xlu0 %v82_v13  ;;  %v85_v16 = vsel %vm81_vm0, %v66_v15, inf  ;;  %vm54_vm5 = vcmp.ne.f32.partialorder %v2634_v4, -100.0  ;;  %vm53_vm6 = vcmp.ne.f32.partialorder %v2639_v5, -100.0  ;;  %vm146_vm7 = vcmp.ge.s32.totalorder %v41_v11, 0  ;;  %v42_v24 = vld [vmem:[%s3659_s1 + $0x2] sm:$0x3] }
   0x6   :  { %v70_v19 = vsel %vm54_vm5, 1.0, %v3665_v6  ;;  %v69_v20 = vsel %vm53_vm6, 1.0, %v3665_v6  ;;  %v154_v22 = vsel %vm146_vm7, 1, %v2570_v21  ;;  %v2671_v23 = vshrl.u32 %v186_v7, 7  ;;  %v2697_v35 = vld [vmem:[%s3658_s0 + $0x48] sm:$0xff]  ;;  %v2709_v40 = vld [vmem:[%s3658_s0 + $0x40] sm:$0xff] }
   0x7   :  { %v97_v25 = vsel %vm81_vm0, %v70_v19, inf  ;;  %v94_v26 = vsel %vm81_vm0, %v69_v20, inf  ;;  %v162_v27 = vrot.slane %v154_v22, 1  ;;  %vm56_vm8 = vcmp.ne.f32.partialorder %v2660_v17, -100.0  ;;  %v43_v44 = vld [vmem:[%s3659_s1 + $0x4] sm:$0x3] }
   0x8   :  { %v2679_v28 = vadd.s32 8, %v2671_v23  ;;  %v2682_v29 = vsub.s32 0, %v2671_v23  ;;  %v2685_v30 = vsub.s32 1, %v2671_v23  ;;  %v72_v31 = vsel %vm56_vm8, 1.0, %v3665_v6 }
   0x9   :  { %92 = vmin.xlane.f32.xlu1 %v91_v14  ;;  %86 = vmin.xlane.f32.xlu0 %v85_v16  ;;  %vm170_vm9 = vcmp.ne.s32.totalorder %v162_v27, 0  ;;  %vm55_vm10 = vcmp.ne.f32.partialorder %v2665_v18, -100.0  ;;  %vm147_vm11 = vcmp.ge.s32.totalorder %v42_v24, 0  ;;  %v103_v37 = vsel %vm81_vm0, %v72_v31, inf }
   0xa   :  { %vm178_vm12 = vmand %vm146_vm7, %vm170_vm9  ;;  %v192_v32 = vrot.slane %v41_v11, %v2682_v29  ;;  %v328_v33 = vrot.slane %v41_v11, %v2685_v30  ;;  %v71_v34 = vsel %vm55_vm10, 1.0, %v3665_v6  ;;  %v155_v38 = vsel %vm147_vm11, 1, %v2570_v21 }
   0xb   :  { %v237_v36 = vsel %vm178_vm12, 1, %v2570_v21  ;;  %v2704_v39 = vrot.slane %v42_v24, %v2682_v29  ;;  %v100_v42 = vsel %vm81_vm0, %v71_v34, inf  ;;  %v163_v43 = vrot.slane %v155_v38, 1 }
   0xc   :  { %vm221_vm14 = vcmp.eq.s32.totalorder %v2671_v23, %v192_v32  ;;  %v248_v41 = vrot.slane %v237_v36, %v2682_v29  ;;  %vm222_vm15 = vcmp.eq.s32.totalorder %v2679_v28, %v192_v32  ;;  %vm58_vm3 = vcmp.ne.f32.partialorder %v2697_v35, -100.0 }
   0xd   :  { %98 = vmin.xlane.f32.xlu1 %v97_v25  ;;  %95 = vmin.xlane.f32.xlu0 %v94_v26  ;;  %vm223_vm1 = vcmp.eq.s32.totalorder %v2671_v23, %v2704_v39  ;;  %vm224_vm2 = vcmp.eq.s32.totalorder %v2679_v28, %v2704_v39 }
   0xe   :  { %11 = vsyncpa [#allocation3], 0  ;;  %vm2723_vm4 = vcmp.eq.s32.totalorder %v248_v41, 1  ;;  %vm2727_vm5 = vcmp.ne.s32.totalorder %v163_v43, 0  ;;  %v74_v47 = vsel %vm58_vm3, 1.0, %v3665_v6  ;;  %vm57_vm6 = vcmp.ne.f32.partialorder %v2709_v40, -100.0 }
   0xf   :  { %vm285_vm7 = vmand %vm221_vm14, %vm2723_vm4  ;;  %v2738_v48 = vrot.slane %v42_v24, %v2685_v30  ;;  %v73_v49 = vsel %vm57_vm6, 1.0, %v3665_v6  ;;  %vm357_vm8 = vcmp.eq.s32.totalorder %v2671_v23, %v328_v33  ;;  %v2745_v50 = vld [vmem:[%s3658_s0 + $0x58] sm:$0xff]  ;;  %v109_v52 = vsel %vm81_vm0, %v74_v47, inf  ;;  %v2775_v60 = vld [vmem:[%s3658_s0 + $0x50] sm:$0xff] }
  0x10   :  { %vm286_vm9 = vmand %vm222_vm15, %vm2723_vm4  ;;  %v301_v51 = vsel %vm285_vm7, 1.0, %v3665_v6  ;;  %vm2571_vm10 = vmmov 0   ;;  %vm358_vm12 = vcmp.eq.s32.totalorder %v2679_v28, %v328_v33  ;;  %vm148_vm14 = vcmp.ge.s32.totalorder %v43_v44, 0  ;;  %v44_v9 = vld [vmem:[%s3659_s1 + $0x6] sm:$0x3]  ;;  %v2824_v20 = vld [vmem:[%s3658_s0 + $0x68] sm:$0xff] }
  0x11   :  { %2316 = vmatprep.mubr.msk.bf16.mxu0 %vm2571_vm10, %v3665_v6  ;;  %2322 = vmatprep.mubr.msk.bf16.mxu1 %vm2571_vm10, %v3665_v6  ;;  %v302_v53 = vsel %vm286_vm9, 1.0, %v3665_v6  ;;  %vm179_vm15 = vmand %vm147_vm11, %vm2727_vm5  ;;  %v106_v54 = vsel %vm81_vm0, %v73_v49, inf  ;;  %v156_v55 = vsel %vm148_vm14, 1, %v2570_v21  ;;  %v200_v56 = vrot.slane %v43_v44, %v2682_v29  ;;  %v2844_v33 = vld [vmem:[%s3658_s0 + $0x60] sm:$0xff]  ;;  %v45_v43 = vld [vmem:[%s3659_s1 + $0x8] sm:$0x3] }
  0x12   :  { %104 = vmin.xlane.f32.xlu1 %v103_v37  ;;  %101 = vmin.xlane.f32.xlu0 %v100_v42  ;;  %v317_v57 = vpack.c.bf16 %v302_v53, %v301_v51  ;;  %v238_v58 = vsel %vm179_vm15, 1, %v2570_v21  ;;  %vm373_vm3 = vmand %vm357_vm8, %vm2723_vm4  ;;  %v164_v59 = vrot.slane %v156_v55, 1  ;;  %vm60_vm6 = vcmp.ne.f32.partialorder %v2745_v50, -100.0  ;;  %v2898_v55 = vld [vmem:[%s3658_s0 + $0x70] sm:$0xff] }
  0x13   :  { %v252_v61 = vrot.slane %v238_v58, %v2682_v29  ;;  %vm374_vm11 = vmand %vm358_vm12, %vm2723_vm4  ;;  %v389_v62 = vsel %vm373_vm3, 1.0, %v3665_v6  ;;  %vm225_vm5 = vcmp.eq.s32.totalorder %v2671_v23, %v200_v56  ;;  %v2785_v63 = vrot.slane %v43_v44, %v2685_v30 }
  0x14   :  { %v418_v7 = vsel %vm413_vm13, %v317_v57, 0  ;;  %vm172_vm7 = vcmp.ne.s32.totalorder %v164_v59, 0  ;;  %vm226_vm8 = vcmp.eq.s32.totalorder %v2679_v28, %v200_v56  ;;  %v76_v8 = vsel %vm60_vm6, 1.0, %v3665_v6 }
  0x15   :  { %2315 = vmatpush3.bf16.xpose.msra.mxu0 %v418_v7  ;;  %vm2793_vm4 = vcmp.eq.s32.totalorder %v252_v61, 1  ;;  %v390_v11 = vsel %vm374_vm11, 1.0, %v3665_v6  ;;  %vm180_vm9 = vmand %vm148_vm14, %vm172_vm7  ;;  %v115_v12 = vsel %vm81_vm0, %v76_v8, inf  ;;  %vm59_vm12 = vcmp.ne.f32.partialorder %v2775_v60, -100.0  ;;  %v46_v8 = vld [vmem:[%s3659_s1 + $0xa] sm:$0x3] }
  0x16   :  { %110 = vmin.xlane.f32.xlu1 %v109_v52  ;;  %vm287_vm15 = vmand %vm223_vm1, %vm2793_vm4  ;;  %107 = vmin.xlane.f32.xlu0 %v106_v54  ;;  %v239_v13 = vsel %vm180_vm9, 1, %v2570_v21  ;;  %v75_v14 = vsel %vm59_vm12, 1.0, %v3665_v6  ;;  %vm359_vm14 = vcmp.eq.s32.totalorder %v2671_v23, %v2738_v48  ;;  %vm360_vm3 = vcmp.eq.s32.totalorder %v2679_v28, %v2738_v48  ;;  %v2884_v48 = vld [vmem:[%s3658_s0 + $0x78] sm:$0xff] }
  0x17   :  { %2326 = vmatprep.subr.bf16.mxu0 %v3665_v6  ;;  %vm288_vm6 = vmand %vm224_vm2, %vm2793_vm4  ;;  %v303_v15 = vsel %vm287_vm15, 1.0, %v3665_v6  ;;  %v256_v16 = vrot.slane %v239_v13, %v2682_v29  ;;  %v112_v19 = vsel %vm81_vm0, %v75_v14, inf  ;;  %vm149_vm1 = vcmp.ge.s32.totalorder %v44_v9, 0 }
  0x18   :  { %v304_v22 = vsel %vm288_vm6, 1.0, %v3665_v6  ;;  %v405_v24 = vpack.c.bf16 %v390_v11, %v389_v62  ;;  %vm375_vm11 = vmand %vm359_vm14, %vm2793_vm4  ;;  %v157_v25 = vsel %vm149_vm1, 1, %v2570_v21  ;;  %v204_v26 = vrot.slane %v44_v9, %v2682_v29 }
  0x19   :  { %v318_v27 = vpack.c.bf16 %v304_v22, %v303_v15  ;;  %vm2832_vm2 = vcmp.eq.s32.totalorder %v256_v16, 1  ;;  %vm376_vm7 = vmand %vm360_vm3, %vm2793_vm4  ;;  %v165_v32 = vrot.slane %v157_v25, 1  ;;  %v391_v34 = vsel %vm375_vm11, 1.0, %v3665_v6 }
  0x1a   :  { %116 = vmin.xlane.f32.xlu1 %v115_v12  ;;  %vm289_vm9 = vmand %vm225_vm5, %vm2832_vm2  ;;  %113 = vmin.xlane.f32.xlu0 %v112_v19  ;;  %v392_v36 = vsel %vm376_vm7, 1.0, %v3665_v6  ;;  %v2853_v37 = vrot.slane %v44_v9, %v2685_v30  ;;  %vm62_vm4 = vcmp.ne.f32.partialorder %v2824_v20, -100.0  ;;  %vm227_vm15 = vcmp.eq.s32.totalorder %v2671_v23, %v204_v26  ;;  %v47_v19 = vld [vmem:[%s3659_s1 + $0xc] sm:$0x3] }
  0x1b   :  { %v465_v38 = vsel %vm413_vm13, %v318_v27, 0  ;;  %vm290_vm12 = vmand %vm226_vm8, %vm2832_vm2  ;;  %v305_v39 = vsel %vm289_vm9, 1.0, %v3665_v6  ;;  %vm173_vm5 = vcmp.ne.s32.totalorder %v165_v32, 0  ;;  %v78_v42 = vsel %vm62_vm4, 1.0, %v3665_v6 }
  0x1c   :  { %2321 = vmatpush3.bf16.xpose.msra.mxu1 %v465_v38  ;;  %2317 = vmatmul.mubr.msk.bf16.vlgmr.msra.gmra.mxu0 %vm413_vm13, %v405_v24  ;;  %v306_v41 = vsel %vm290_vm12, 1.0, %v3665_v6  ;;  %vm181_vm14 = vmand %vm149_vm1, %vm173_vm5  ;;  %vm61_vm3 = vcmp.ne.f32.partialorder %v2844_v33, -100.0  ;;  %vm361_vm6 = vcmp.eq.s32.totalorder %v2671_v23, %v2785_v63  ;;  %v121_v46 = vsel %vm81_vm0, %v78_v42, inf }
  0x1d   :  { %v319_v44 = vpack.c.bf16 %v306_v41, %v305_v39  ;;  %2332 = vmatprep.subr.bf16.mxu1 %v3665_v6  ;;  %v240_v45 = vsel %vm181_vm14, 1, %v2570_v21  ;;  %v77_v47 = vsel %vm61_vm3, 1.0, %v3665_v6  ;;  %2328 = vmatprep.mubr.msk.bf16.mxu0 %vm2571_vm10, %v3665_v6  ;;  %vm377_vm8 = vmand %vm361_vm6, %vm2832_vm2  ;;  %vm362_vm1 = vcmp.eq.s32.totalorder %v2679_v28, %v2785_v63 }
  0x1e   :  { %v260_v49 = vrot.slane %v240_v45, %v2682_v29  ;;  %122 = vmin.xlane.f32.xlu1 %v121_v46  ;;  %v118_v51 = vsel %vm81_vm0, %v77_v47, inf  ;;  %v393_v52 = vsel %vm377_vm8, 1.0, %v3665_v6  ;;  %v406_v54 = vpack.c.bf16 %v392_v36, %v391_v34  ;;  %vm378_vm7 = vmand %vm362_vm1, %vm2832_vm2  ;;  %v2971_v36 = vld [vmem:[%s3659_s1 + $0xe] sm:$0x3] }
  0x1f   :  { %v512_v53 = vsel %vm413_vm13, %v319_v44, 0  ;;  %vm228_vm11 = vcmp.eq.s32.totalorder %v2679_v28, %v204_v26  ;;  %119 = vmin.xlane.f32.xlu0 %v118_v51  ;;  %vm150_vm9 = vcmp.ge.s32.totalorder %v45_v43, 0  ;;  %v394_v57 = vsel %vm378_vm7, 1.0, %v3665_v6 }
  0x20   :  { %2327 = vmatpush3.bf16.xpose.msra.mxu0 %v512_v53  ;;  %vm2900_vm4 = vcmp.eq.s32.totalorder %v260_v49, 1  ;;  %v158_v58 = vsel %vm150_vm9, 1, %v2570_v21  ;;  %vm64_vm12 = vcmp.ne.f32.partialorder %v2884_v48, -100.0  ;;  %v407_v59 = vpack.c.bf16 %v394_v57, %v393_v52 }
  0x21   :  { %vm291_vm2 = vmand %vm227_vm15, %vm2900_vm4  ;;  %2338 = vmatprep.subr.bf16.mxu0 %v3665_v6  ;;  %v166_v61 = vrot.slane %v158_v58, 1  ;;  %v208_v62 = vrot.slane %v45_v43, %v2682_v29  ;;  %v80_v7 = vsel %vm64_vm12, 1.0, %v3665_v6  ;;  %vm63_vm14 = vcmp.ne.f32.partialorder %v2898_v55, -100.0 }
  0x22   :  { %vm292_vm5 = vmand %vm228_vm11, %vm2900_vm4  ;;  %v307_v63 = vsel %vm291_vm2, 1.0, %v3665_v6  ;;  %vm363_vm15 = vcmp.eq.s32.totalorder %v2671_v23, %v2853_v37  ;;  %v127_v10 = vsel %vm81_vm0, %v80_v7, inf  ;;  %v79_v11 = vsel %vm63_vm14, 1.0, %v3665_v6 }
  0x23   :  { %2323 = vmatmul.mubr.msk.bf16.vlgmr.msra.gmra.mxu1 %vm413_vm13, %v406_v54  ;;  %v308_v9 = vsel %vm292_vm5, 1.0, %v3665_v6  ;;  %vm174_vm3 = vcmp.ne.s32.totalorder %v166_v61, 0  ;;  %vm2932_vm6 = vmand %vm363_vm15, %vm2900_vm4  ;;  %128 = vmin.xlane.f32.xlu1 %v127_v10  ;;  %v124_v14 = vsel %vm81_vm0, %v79_v11, inf  ;;  %vm364_vm1 = vcmp.eq.s32.totalorder %v2679_v28, %v2853_v37  ;;  %v911_v11 = vld [vmem:[%s3660_s2] sm:$0xff] }
  0x24   :  { %v320_v13 = vpack.c.bf16 %v308_v9, %v307_v63  ;;  %vm182_vm8 = vmand %vm150_vm9, %vm174_vm3  ;;  %2334 = vmatprep.mubr.msk.bf16.mxu1 %vm2571_vm10, %v3665_v6  ;;  %v344_v16 = vrot.slane %v45_v43, %v2685_v30  ;;  %125 = vmin.xlane.f32.xlu0 %v124_v14  ;;  %vm151_vm7 = vcmp.ge.s32.totalorder %v46_v8, 0  ;;  %vm229_vm9 = vcmp.eq.s32.totalorder %v2671_v23, %v208_v62 }
  0x25   :  { %v241_v15 = vsel %vm182_vm8, 1, %v2570_v21  ;;  %vm380_vm11 = vmand %vm364_vm1, %vm2900_vm4  ;;  %v159_v25 = vsel %vm151_vm7, 1, %v2570_v21  ;;  %vm230_vm12 = vcmp.eq.s32.totalorder %v2679_v28, %v208_v62  ;;  %v395_v26 = vsel %vm2932_vm6, 1.0, %v3665_v6 }
  0x26   :  { %v559_v22 = vsel %vm413_vm13, %v320_v13, 0  ;;  %v264_v24 = vrot.slane %v241_v15, %v2682_v29  ;;  %v396_v27 = vsel %vm380_vm11, 1.0, %v3665_v6  ;;  %v167_v31 = vrot.slane %v159_v25, 1 }
  0x27   :  { %2333 = vmatpush3.bf16.xpose.msra.mxu1 %v559_v22  ;;  %2329 = vmatmul.mubr.msk.bf16.vlgmr.msra.gmra.mxu0 %vm413_vm13, %v407_v59  ;;  %v212_v34 = vrot.slane %v46_v8, %v2682_v29  ;;  %vm152_vm2 = vcmp.ge.s32.totalorder %v47_v19, 0  ;;  %v348_v37 = vrot.slane %v46_v8, %v2685_v30  ;;  %vm365_vm15 = vcmp.eq.s32.totalorder %v2671_v23, %v344_v16 }
  0x28   :  { %vm2960_vm4 = vcmp.eq.s32.totalorder %v264_v24, 1  ;;  %2344 = vmatprep.subr.bf16.mxu1 %v3665_v6  ;;  %2340 = vmatprep.mubr.msk.bf16.mxu0 %vm2571_vm10, %v3665_v6  ;;  %vm175_vm14 = vcmp.ne.s32.totalorder %v167_v31, 0  ;;  %v160_v38 = vsel %vm152_vm2, 1, %v2570_v21  ;;  %v408_v41 = vpack.c.bf16 %v396_v27, %v395_v26 }
  0x29   :  { %vm293_vm5 = vmand %vm229_vm9, %vm2960_vm4  ;;  %vm366_vm6 = vcmp.eq.s32.totalorder %v2679_v28, %v344_v16  ;;  %v168_v42 = vrot.slane %v160_v38, 1  ;;  %v216_v44 = vrot.slane %v47_v19, %v2682_v29  ;;  %vm153_vm1 = vcmp.ge.s32.totalorder %v2971_v36, 0 }
  0x2a   :  { %vm294_vm3 = vmand %vm230_vm12, %vm2960_vm4  ;;  %v309_v39 = vsel %vm293_vm5, 1.0, %v3665_v6  ;;  %v161_v47 = vsel %vm153_vm1, 1, %v2570_v21  ;;  %vm231_vm12 = vcmp.eq.s32.totalorder %v2671_v23, %v212_v34  ;;  %vm232_vm5 = vcmp.eq.s32.totalorder %v2679_v28, %v212_v34 }
  0x2b   :  { %v310_v43 = vsel %vm294_vm3, 1.0, %v3665_v6  ;;  %vm183_vm8 = vmand %vm151_vm7, %vm175_vm14  ;;  %vm176_vm9 = vcmp.ne.s32.totalorder %v168_v42, 0  ;;  %v169_v57 = vrot.slane %v161_v47, 1  ;;  %v352_v59 = vrot.slane %v47_v19, %v2685_v30 }
  0x2c   :  { %v321_v45 = vpack.c.bf16 %v310_v43, %v309_v39  ;;  %v242_v46 = vsel %vm183_vm8, 1, %v2570_v21  ;;  %vm381_vm11 = vmand %vm365_vm15, %vm2960_vm4  ;;  %vm367_vm15 = vcmp.eq.s32.totalorder %v2671_v23, %v348_v37  ;;  %vm234_vm8 = vcmp.eq.s32.totalorder %v2679_v28, %v216_v44 }
  0x2d   :  { %v268_v49 = vrot.slane %v242_v46, %v2682_v29  ;;  %vm382_vm7 = vmand %vm366_vm6, %vm2960_vm4  ;;  %v397_v52 = vsel %vm381_vm11, 1.0, %v3665_v6  ;;  %v220_v13 = vrot.slane %v2971_v36, %v2682_v29  ;;  %v356_v16 = vrot.slane %v2971_v36, %v2685_v30 }
  0x2e   :  { %v606_v51 = vsel %vm413_vm13, %v321_v45, 0  ;;  %2335 = vmatmul.mubr.msk.bf16.vlgmr.msra.gmra.mxu1 %vm413_vm13, %v408_v41  ;;  %vm184_vm14 = vmand %vm152_vm2, %vm176_vm9  ;;  %v398_v54 = vsel %vm382_vm7, 1.0, %v3665_v6  ;;  %vm233_vm2 = vcmp.eq.s32.totalorder %v2671_v23, %v216_v44  ;;  %vm368_vm9 = vcmp.eq.s32.totalorder %v2679_v28, %v348_v37 }
  0x2f   :  { %2339 = vmatpush3.bf16.xpose.msra.mxu0 %v606_v51  ;;  %vm3007_vm3 = vcmp.eq.s32.totalorder %v268_v49, 1  ;;  %v243_v56 = vsel %vm184_vm14, 1, %v2570_v21  ;;  %2346 = vmatprep.mubr.msk.bf16.mxu1 %vm2571_vm10, %v3665_v6  ;;  %v409_v63 = vpack.c.bf16 %v398_v54, %v397_v52  ;;  %v912_v25 = vpack.c.bf16 %v911_v11, %v911_v11 }
  0x30   :  { %vm295_vm4 = vmand %vm231_vm12, %vm3007_vm3  ;;  %2350 = vmatprep.subr.bf16.mxu0 %v3665_v6  ;;  %v272_v58 = vrot.slane %v243_v56, %v2682_v29 }
  0x31   :  { %vm296_vm6 = vmand %vm232_vm5, %vm3007_vm3  ;;  %v311_v61 = vsel %vm295_vm4, 1.0, %v3665_v6  ;;  %vm3045_vm5 = vcmp.ne.s32.totalorder %v169_v57, 0 }
  0x32   :  { %v312_v62 = vsel %vm296_vm6, 1.0, %v3665_v6  ;;  %vm3030_vm11 = vcmp.eq.s32.totalorder %v272_v58, 1  ;;  %vm3039_vm12 = vmand %vm367_vm15, %vm3007_vm3  ;;  %vm369_vm15 = vcmp.eq.s32.totalorder %v2671_v23, %v352_v59 }
  0x33   :  { %v322_v9 = vpack.c.bf16 %v312_v62, %v311_v61  ;;  %vm297_vm7 = vmand %vm233_vm2, %vm3030_vm11  ;;  %vm370_vm2 = vcmp.eq.s32.totalorder %v2679_v28, %v352_v59  ;;  %v399_v22 = vsel %vm3039_vm12, 1.0, %v3665_v6  ;;  %vm236_vm12 = vcmp.eq.s32.totalorder %v2679_v28, %v220_v13 }
  0x34   :  { %vm298_vm14 = vmand %vm234_vm8, %vm3030_vm11  ;;  %v313_v12 = vsel %vm297_vm7, 1.0, %v3665_v6  ;;  %vm948_vm8 = vcmask 1043456  }
  0x35   :  { %v653_v14 = vsel %vm413_vm13, %v322_v9, 0  ;;  %v314_v15 = vsel %vm298_vm14, 1.0, %v3665_v6  ;;  %vm384_vm4 = vmand %vm368_vm9, %vm3007_vm3  ;;  %vm235_vm9 = vcmp.eq.s32.totalorder %v2671_v23, %v220_v13 }
  0x36   :  { %2345 = vmatpush3.bf16.xpose.msra.mxu1 %v653_v14  ;;  %2341 = vmatmul.mubr.msk.bf16.vlgmr.msra.gmra.mxu0 %vm413_vm13, %v409_v63  ;;  %v323_v19 = vpack.c.bf16 %v314_v15, %v313_v12  ;;  %v400_v24 = vsel %vm384_vm4, 1.0, %v3665_v6  ;;  %vm185_vm3 = vmand %vm153_vm1, %vm3045_vm5  ;;  %vm371_vm5 = vcmp.eq.s32.totalorder %v2671_v23, %v356_v16  ;;  %v950_v23 = vsel %vm948_vm8, %v912_v25, 0 }
  0x37   :  { %2356 = vmatprep.subr.bf16.mxu1 %v3665_v6  ;;  %v244_v30 = vsel %vm185_vm3, 1, %v2570_v21  ;;  %2352 = vmatprep.mubr.msk.bf16.mxu0 %vm2571_vm10, %v3665_v6  ;;  %vm385_vm6 = vmand %vm369_vm15, %vm3030_vm11  ;;  %v410_v21 = vpack.c.bf16 %v400_v24, %v399_v22  ;;  %vm372_vm15 = vcmp.eq.s32.totalorder %v2679_v28, %v356_v16  ;;  %vm790_vm3 = vcmask 130048  }
  0x38   :  { %v700_v26 = vsel %vm413_vm13, %v323_v19, 0  ;;  %v276_v27 = vrot.slane %v244_v30, %v2682_v29  ;;  %vm386_vm1 = vmand %vm370_vm2, %vm3030_vm11  ;;  %v401_v31 = vsel %vm385_vm6, 1.0, %v3665_v6  ;;  %vm2180_vm6 = vcmask 1043459  }
  0x39   :  { %2351 = vmatpush3.bf16.xpose.msra.mxu0 %v700_v26  ;;  %v402_v32 = vsel %vm386_vm1, 1.0, %v3665_v6  ;;  %vm2186_vm1 = vcmask 1046534  }
  0x3a   :  { %vm284_vm7 = vcmp.eq.s32.totalorder %v276_v27, 1  ;;  %2494 = vmatprep.subr.msk.bf16.mxu0 %vm948_vm8, %v912_v25  ;;  %v411_v34 = vpack.c.bf16 %v402_v32, %v401_v31  ;;  %vm2182_vm8 = vcmask 1044484  }
  0x3b   :  { %vm299_vm14 = vmand %vm235_vm9, %vm284_vm7  ;;  %vm2184_vm9 = vcmask 1045509  }
  0x3c   :  { %vm300_vm4 = vmand %vm236_vm12, %vm284_vm7  ;;  %v315_v29 = vsel %vm299_vm14, 1.0, %v3665_v6  ;;  %vm2188_vm12 = vcmask 1047559  }
  0x3d   :  { %2347 = vmatmul.mubr.msk.bf16.vlgmr.msra.gmra.mxu1 %vm413_vm13, %v410_v21  ;;  %v316_v36 = vsel %vm300_vm4, 1.0, %v3665_v6  ;;  %vm387_vm11 = vmand %vm371_vm5, %vm284_vm7 }
  0x3e   :  { %v324_v37 = vpack.c.bf16 %v316_v36, %v315_v29  ;;  %2358 = vmatprep.mubr.msk.bf16.mxu1 %vm2571_vm10, %v3665_v6  ;;  %vm388_vm2 = vmand %vm372_vm15, %vm284_vm7  ;;  %v403_v28 = vsel %vm387_vm11, 1.0, %v3665_v6 }
  0x3f   :  { %v404_v39 = vsel %vm388_vm2, 1.0, %v3665_v6 }
  0x40   :  { %v747_v38 = vsel %vm413_vm13, %v324_v37, 0  ;;  %2353 = vmatmul.mubr.msk.bf16.vlgmr.msra.gmra.mxu0 %vm413_vm13, %v411_v34  ;;  %v412_v41 = vpack.c.bf16 %v404_v39, %v403_v28 }
  0x41   :  { %2357 = vmatpush3.bf16.xpose.msra.mxu1 %v747_v38  ;;  %2363 = vmatpush3.bf16.msra.mxu0 %v950_v23 }
  0x42   :  { %2380 = vmatprep.subr.bf16.mxu1 %v3665_v6  ;;  %2404 = vmatprep.subr.bf16.mxu0 %v3665_v6 }
  0x48   :  { %2359 = vmatmul.mubr.msk.bf16.vlgmr.msra.gmra.mxu1 %vm413_vm13, %v412_v41 }
  0x49   :  { %2382 = vmatprep.mubr.msk.bf16.mxu1 %vm2571_vm10, %v3665_v6 }
  0x8e   :  { %v3110_v42 = vpop.xlane.xlu1 %89  ;;  %v3112_v43 = vpop.xlane.xlu0 %83 }
  0x8f   :  { %v132_v46 = vmul.f32 %v3110_v42, %v2611_v0  ;;  %v130_v49 = vmul.f32 %v3112_v43, %v2616_v1 }
  0x92   :  { %v3114_v44 = vpop.xlane.xlu1 %92  ;;  %v3116_v45 = vpop.xlane.xlu0 %86 }
  0x93   :  { %v133_v47 = vmul.f32 %v3114_v44, %v2621_v2  ;;  %v131_v51 = vmul.f32 %v3116_v45, %v2629_v3 }
  0x95   :  { %v916_v52 = vpack.c.bf16 %v131_v51, %v130_v49  ;;  %v917_v53 = vpack.c.bf16 %v133_v47, %v132_v46 }
  0x96   :  { %v3126_v54 = vpop.xlane.xlu1 %98  ;;  %v3128_v56 = vpop.xlane.xlu0 %95 }
  0x97   :  { %2364 = vmatprep.mubr.msk.bf16.mxu0 %vm81_vm0, %v916_v52  ;;  %v134_v0 = vmul.f32 %v3128_v56, %v2639_v5  ;;  %v135_v2 = vmul.f32 %v3126_v54, %v2634_v4 }
  0x98   :  { %2365 = vmatmul.mubr.msk.bf16.vlgmr.msra.gmra.mxu0 %vm81_vm0, %v917_v53 }
  0x99   :  { %v918_v3 = vpack.c.bf16 %v135_v2, %v134_v0 }
  0x9b   :  { %v3136_v1 = vpop.xlane.xlu1 %104  ;;  %v3138_v57 = vpop.xlane.xlu0 %101  ;;  %2368 = vmatprep.mubr.msk.bf16.mxu0 %vm81_vm0, %v918_v3 }
  0x9c   :  { %v136_v58 = vmul.f32 %v3138_v57, %v2665_v18  ;;  %v137_v59 = vmul.f32 %v3136_v1, %v2660_v17 }
  0x9e   :  { %v919_v5 = vpack.c.bf16 %v137_v59, %v136_v58 }
  0x9f   :  { %v3145_v61 = vpop.xlane.xlu1 %110  ;;  %v3147_v62 = vpop.xlane.xlu0 %107 }
  0xa0   :  { %2369 = vmatmul.mubr.msk.bf16.gmra.mxu0 %vm81_vm0, %v919_v5  ;;  %v138_v4 = vmul.f32 %v3147_v62, %v2709_v40  ;;  %v139_v63 = vmul.f32 %v3145_v61, %v2697_v35 }
  0xa2   :  { %v920_v8 = vpack.c.bf16 %v139_v63, %v138_v4 }
  0xa3   :  { %v3154_v7 = vpop.xlane.xlu1 %116  ;;  %v3156_v18 = vpop.xlane.xlu0 %113 }
  0xa4   :  { %v141_v17 = vmul.f32 %v3154_v7, %v2745_v50  ;;  %2372 = vmatprep.mubr.msk.bf16.mxu0 %vm81_vm0, %v920_v8  ;;  %v140_v9 = vmul.f32 %v3156_v18, %v2775_v60 }
  0xa6   :  { %v921_v10 = vpack.c.bf16 %v141_v17, %v140_v9 }
  0xa7   :  { %v3163_v11 = vpop.xlane.xlu1 %122 }
  0xa8   :  { %3704 = vst [vmem:[#allocation5_spill] sm:$0xff] %v3163_v11  ;;  %v3165_v40 = vpop.xlane.xlu0 %119  ;;  %2373 = vmatmul.mubr.msk.bf16.gmra.mxu0 %vm81_vm0, %v921_v10  ;;  %v143_v35 = vmul.f32 %v3163_v11, %v2824_v20 }
  0xa9   :  { %v142_v12 = vmul.f32 %v3165_v40, %v2844_v33 }
  0xab   :  { %v922_v13 = vpack.c.bf16 %v143_v35, %v142_v12 }
  0xac   :  { %v3172_v50 = vpop.xlane.xlu1 %128 }
  0xad   :  { %3705 = vst [vmem:[#allocation6_spill] sm:$0xff] %v3172_v50  ;;  %2376 = vmatprep.mubr.msk.bf16.mxu0 %vm81_vm0, %v922_v13  ;;  %v3175_v14 = vpop.xlane.xlu0 %125  ;;  %v145_v60 = vmul.f32 %v3172_v50, %v2884_v48 }
  0xae   :  { %v144_v15 = vmul.f32 %v3175_v14, %v2898_v55 }
  0xb0   :  { %v923_v16 = vpack.c.bf16 %v145_v60, %v144_v15 }
  0xb2   :  { %2377 = vmatmul.mubr.msk.bf16.gmra.mxu0 %vm81_vm0, %v923_v16  ;;  %vm2176_vm0 = vcmask 1041409  }
  0xb3   :  { %2406 = vmatprep.mubr.msk.bf16.mxu0 %vm2571_vm10, %v3665_v6 }
  0xdc   :  { %v454_v20 = vpop.f32.mrf.mxu0 }
  0xdd   :  { %v791_v33 = vsel %vm790_vm3, %v454_v20, 0.0 }
  0xde   :  { %v2318_v19 = vpop.f32.mrf.mxu0  ;;  %792 = vadd.xlane.f32.xlu0 %v791_v33 }
  0xe0   :  { %v457_v22 = vpop.f32.mrf.mxu0 }
  0xe1   :  { %v3185_v24 = vpack.c.bf16 %v457_v22, %v454_v20  ;;  %v794_v48 = vsel %vm790_vm3, %v457_v22, 0.0 }
  0xe2   :  { %v2319_v25 = vpop.f32.mrf.mxu0  ;;  %795 = vadd.xlane.f32.xlu1 %v794_v48 }
  0xe3   :  { %v501_v55 = vpop.f32.mrf.mxu1 }
  0xe4   :  { %v797_v30 = vsel %vm790_vm3, %v501_v55, 0.0 }
  0xe5   :  { %v2324_v26 = vpop.f32.mrf.mxu1  ;;  %798 = vadd.xlane.f32.xlu0 %v797_v30 }
  0xe7   :  { %v504_v27 = vpop.f32.mrf.mxu1  ;;  %v548_v21 = vpop.f32.mrf.mxu0 }
  0xe8   :  { %v3189_v31 = vpack.c.bf16 %v504_v27, %v501_v55  ;;  %v800_v32 = vsel %vm790_vm3, %v504_v27, 0.0  ;;  %v803_v29 = vsel %vm790_vm3, %v548_v21, 0.0 }
  0xe9   :  { %v2325_v34 = vpop.f32.mrf.mxu1  ;;  %v2330_v36 = vpop.f32.mrf.mxu0  ;;  %801 = vadd.xlane.f32.xlu1 %v800_v32  ;;  %804 = vadd.xlane.f32.xlu0 %v803_v29 }
  0xeb   :  { %v551_v37 = vpop.f32.mrf.mxu0 }
  0xec   :  { %v3193_v23 = vpack.c.bf16 %v551_v37, %v548_v21  ;;  %v806_v38 = vsel %vm790_vm3, %v551_v37, 0.0 }
  0xed   :  { %v2331_v28 = vpop.f32.mrf.mxu0  ;;  %807 = vadd.xlane.f32.xlu1 %v806_v38 }
  0xee   :  { %v595_v39 = vpop.f32.mrf.mxu1 }
  0xef   :  { %v809_v41 = vsel %vm790_vm3, %v595_v39, 0.0 }
  0xf0   :  { %v2336_v46 = vpop.f32.mrf.mxu1  ;;  %810 = vadd.xlane.f32.xlu0 %v809_v41 }
  0xf2   :  { %v598_v47 = vpop.f32.mrf.mxu1 }
  0xf3   :  { %v3197_v49 = vpack.c.bf16 %v598_v47, %v595_v39  ;;  %v812_v51 = vsel %vm790_vm3, %v598_v47, 0.0 }
  0xf4   :  { %v2337_v52 = vpop.f32.mrf.mxu1  ;;  %813 = vadd.xlane.f32.xlu1 %v812_v51 }
  0xf6   :  { %v642_v53 = vpop.f32.mrf.mxu0 }
  0xf7   :  { %v815_v0 = vsel %vm790_vm3, %v642_v53, 0.0 }
  0xf8   :  { %v2342_v2 = vpop.f32.mrf.mxu0  ;;  %816 = vadd.xlane.f32.xlu0 %v815_v0 }
  0xfa   :  { %v645_v3 = vpop.f32.mrf.mxu0 }
  0xfb   :  { %v3201_v58 = vpack.c.bf16 %v645_v3, %v642_v53  ;;  %v818_v59 = vsel %vm790_vm3, %v645_v3, 0.0 }
  0xfc   :  { %v2343_v5 = vpop.f32.mrf.mxu0  ;;  %819 = vadd.xlane.f32.xlu1 %v818_v59 }
  0xfd   :  { %v689_v4 = vpop.f32.mrf.mxu1 }
  0xfe   :  { %v821_v63 = vsel %vm790_vm3, %v689_v4, 0.0 }
  0xff   :  { %v2348_v8 = vpop.f32.mrf.mxu1  ;;  %822 = vadd.xlane.f32.xlu0 %v821_v63 }
 0x100   :  { %v736_v17 = vpop.f32.mrf.mxu0 }
 0x101   :  { %v692_v9 = vpop.f32.mrf.mxu1  ;;  %v827_v10 = vsel %vm790_vm3, %v736_v17, 0.0 }
 0x102   :  { %v3206_v35 = vpack.c.bf16 %v692_v9, %v689_v4  ;;  %v2354_v12 = vpop.f32.mrf.mxu0  ;;  %v824_v13 = vsel %vm790_vm3, %v692_v9, 0.0  ;;  %v914_v9 = vld [vmem:[%s3662_s4 + $0x8] sm:$0xff] }
 0x103   :  { %v2349_v60 = vpop.f32.mrf.mxu1  ;;  %825 = vadd.xlane.f32.xlu1 %v824_v13  ;;  %828 = vadd.xlane.f32.xlu0 %v827_v10 }
 0x104   :  { %v739_v15 = vpop.f32.mrf.mxu0 }
 0x105   :  { %v3209_v16 = vpack.c.bf16 %v739_v15, %v736_v17  ;;  %v830_v20 = vsel %vm790_vm3, %v739_v15, 0.0  ;;  %v913_v17 = vld [vmem:[%s3662_s4] sm:$0xff] }
 0x106   :  { %v2355_v33 = vpop.f32.mrf.mxu0  ;;  %v915_v10 = vpack.c.bf16 %v914_v9, %v913_v17 }
 0x107   :  { %831 = vadd.xlane.f32.xlu1 %v830_v20 }
 0x108   :  { %v783_v19 = vpop.f32.mrf.mxu1 }
 0x109   :  { %v833_v22 = vsel %vm790_vm3, %v783_v19, 0.0 }
 0x10a   :  { %v2360_v48 = vpop.f32.mrf.mxu1  ;;  %834 = vadd.xlane.f32.xlu0 %v833_v22 }
 0x10c   :  { %v786_v25 = vpop.f32.mrf.mxu1 }
 0x10d   :  { %v3213_v55 = vpack.c.bf16 %v786_v25, %v783_v19  ;;  %v836_v30 = vsel %vm790_vm3, %v786_v25, 0.0 }
 0x10e   :  { %837 = vadd.xlane.f32.xlu1 %v836_v30  ;;  %v2361_v26 = vpop.f32.mrf.mxu1 }
 0x158   :  { %v3216_v27 = vpop.f32.mrf.mxu0 }
 0x15a   :  { %v3218_v21 = vpop.f32.mrf.mxu0 }
 0x15b   :  { %v1057_v17 = vmul.f32 %v3218_v21, %v3112_v43 }
 0x15c   :  { %v3220_v32 = vpop.f32.mrf.mxu0 }
 0x15d   :  { %v1050_v38 = vpack.c.bf16 %v3220_v32, %v3216_v27 }
 0x15e   :  { %v3222_v29 = vpop.f32.mrf.mxu0 }
 0x15f   :  { %v1049_v34 = vpack.c.bf16 %v3222_v29, %v3218_v21  ;;  %v3326_v21 = vld [vmem:[%s3661_s3] ss:$0 sm:$0xff] }
 0x160   :  { %v3226_v36 = vpop.f32.mrf.mxu0 }
 0x161   :  { %2381 = vmatpush3.bf16.msra.mxu1 %v1049_v34 }
 0x162   :  { %v3228_v37 = vpop.f32.mrf.mxu0  ;;  %2386 = vmatprep.subr.bf16.mxu1 %v3665_v6 }
 0x164   :  { %v3233_v28 = vpop.f32.mrf.mxu0  ;;  %2383 = vmatmul.mubr.msk.bf16.vlgmr.msra.gmra.mxu1 %vm790_vm3, %v3185_v24 }
 0x165   :  { %2387 = vmatpush3.bf16.msra.mxu1 %v1050_v38  ;;  %2388 = vmatprep.mubr.msk.bf16.mxu1 %vm2571_vm10, %v3665_v6  ;;  %v1052_v0 = vpack.c.bf16 %v3233_v28, %v3226_v36 }
 0x166   :  { %v3239_v39 = vpop.f32.mrf.mxu0  ;;  %2392 = vmatprep.subr.bf16.mxu1 %v3665_v6 }
 0x167   :  { %v1051_v46 = vpack.c.bf16 %v3239_v39, %v3228_v37  ;;  %v793_v12 = vpop.xlane.xlu0 %792 }
 0x168   :  { %v3242_v41 = vpop.f32.mrf.mxu0  ;;  %v839_v20 = vadd.f32 %v793_v12, %v3112_v43 }
 0x16a   :  { %v3246_v47 = vpop.f32.mrf.mxu0  ;;  %v855_v19 = vmax.f32 %v839_v20, 1.0 }
 0x16b   :  { %v796_v13 = vpop.xlane.xlu1 %795 }
 0x16c   :  { %v3248_v51 = vpop.f32.mrf.mxu0  ;;  %2389 = vmatmul.mubr.msk.bf16.vlgmr.msra.gmra.mxu1 %vm790_vm3, %v3189_v31  ;;  %v840_v22 = vadd.f32 %v796_v13, %v3116_v45  ;;  %2499 = vrcp.f32 %v855_v19 }
 0x16d   :  { %2393 = vmatpush3.bf16.msra.mxu1 %v1051_v46  ;;  %2394 = vmatprep.mubr.msk.bf16.mxu1 %vm2571_vm10, %v3665_v6  ;;  %v1054_v5 = vpack.c.bf16 %v3248_v51, %v3242_v41 }
 0x16e   :  { %v3254_v52 = vpop.f32.mrf.mxu0  ;;  %2398 = vmatprep.subr.bf16.mxu1 %v3665_v6  ;;  %v799_v60 = vpop.xlane.xlu0 %798  ;;  %v856_v25 = vmax.f32 %v840_v22, 1.0 }
 0x16f   :  { %v1053_v53 = vpack.c.bf16 %v3254_v52, %v3246_v47  ;;  %v841_v30 = vadd.f32 %v799_v60, %v3110_v42 }
 0x170   :  { %2501 = vrcp.f32 %v856_v25 }
 0x171   :  { %2405 = vmatpush3.bf16.msra.mxu0 %v1053_v53  ;;  %v857_v38 = vmax.f32 %v841_v30, 1.0 }
 0x172   :  { %2416 = vmatprep.subr.bf16.mxu0 %v3665_v6  ;;  %v3262_v2 = vpop.f32.mrf.mxu0  ;;  %v802_v15 = vpop.xlane.xlu1 %801 }
 0x173   :  { %v805_v33 = vpop.xlane.xlu0 %804  ;;  %v842_v46 = vadd.f32 %v802_v15, %v3114_v44  ;;  %2503 = vrcp.f32 %v857_v38 }
 0x174   :  { %2395 = vmatmul.mubr.msk.bf16.vlgmr.msra.gmra.mxu1 %vm790_vm3, %v3193_v23  ;;  %2407 = vmatmul.mubr.msk.bf16.vlgmr.msra.gmra.mxu0 %vm790_vm3, %v3201_v58  ;;  %v3268_v3 = vpop.f32.mrf.mxu0 }
 0x175   :  { %2399 = vmatpush3.bf16.msra.mxu1 %v1052_v0  ;;  %2400 = vmatprep.mubr.msk.bf16.mxu1 %vm2571_vm10, %v3665_v6  ;;  %v858_v0 = vmax.f32 %v842_v46, 1.0 }
 0x176   :  { %2410 = vmatprep.subr.bf16.mxu1 %v3665_v6  ;;  %2418 = vmatprep.mubr.msk.bf16.mxu0 %vm2571_vm10, %v3665_v6  ;;  %v3275_v59 = vpop.f32.mrf.mxu0  ;;  %v808_v48 = vpop.xlane.xlu1 %807 }
 0x177   :  { %v1056_v8 = vpack.c.bf16 %v3275_v59, %v3262_v2  ;;  %2505 = vrcp.f32 %v858_v0  ;;  %v844_v12 = vadd.f32 %v808_v48, %v3126_v54 }
 0x178   :  { %v3279_v4 = vpop.f32.mrf.mxu0 }
 0x179   :  { %v1055_v63 = vpack.c.bf16 %v3279_v4, %v3268_v3  ;;  %v811_v26 = vpop.xlane.xlu0 %810  ;;  %v3317_v60 = vpop.eup %2499  ;;  %v860_v48 = vmax.f32 %v844_v12, 1.0 }
 0x17a   :  { %v845_v38 = vadd.f32 %v811_v26, %v3138_v57 }
 0x17b   :  { %2417 = vmatpush3.bf16.msra.mxu0 %v1055_v63 }
 0x17c   :  { %2401 = vmatmul.mubr.msk.bf16.vlgmr.msra.gmra.mxu1 %vm790_vm3, %v3197_v49  ;;  %2428 = vmatprep.subr.bf16.mxu0 %v915_v10  ;;  %v861_v12 = vmax.f32 %v845_v38, 1.0 }
 0x17d   :  { %2411 = vmatpush3.bf16.msra.mxu1 %v1054_v5  ;;  %2412 = vmatprep.mubr.msk.bf16.mxu1 %vm2571_vm10, %v3665_v6  ;;  %v814_v34 = vpop.xlane.xlu1 %813  ;;  %v843_v5 = vadd.f32 %v805_v33, %v3128_v56  ;;  %v1058_v33 = vmul.f32 %v3222_v29, %v3116_v45  ;;  %v3329_v0 = vpop.eup %2501 }
 0x17e   :  { %2422 = vmatprep.subr.bf16.mxu1 %v3665_v6  ;;  %2419 = vmatmul.mubr.msk.bf16.vlgmr.msra.gmra.mxu0 %vm790_vm3, %v3209_v16 }
 0x17f   :  { %2429 = vmatpush3.bf16.msra.mxu0 %v915_v10  ;;  %v859_v10 = vmax.f32 %v843_v5, 1.0 }
 0x180   :  { %2470 = vmatprep.subr.bf16.mxu0 %v3665_v6 }
 0x181   :  { %v817_v53 = vpop.xlane.xlu0 %816  ;;  %2507 = vrcp.f32 %v859_v10 }
 0x184   :  { %2413 = vmatmul.mubr.msk.bf16.vlgmr.msra.gmra.mxu1 %vm790_vm3, %v3206_v35 }
 0x185   :  { %2423 = vmatpush3.bf16.msra.mxu1 %v1056_v8  ;;  %2424 = vmatprep.mubr.msk.bf16.mxu1 %vm2571_vm10, %v3665_v6  ;;  %v820_v63 = vpop.xlane.xlu1 %819  ;;  %v847_v8 = vadd.f32 %v817_v53, %v3147_v62 }
 0x186   :  { %2446 = vmatprep.subr.bf16.mxu1 %v3665_v6  ;;  %v848_v20 = vadd.f32 %v820_v63, %v3145_v61  ;;  %v1059_v63 = vmul.f32 %v3216_v27, %v3110_v42  ;;  %v1060_v27 = vmul.f32 %v3220_v32, %v3114_v44  ;;  %v1061_v32 = vmul.f32 %v3228_v37, %v3128_v56 }
 0x187   :  { %v863_v15 = vmax.f32 %v847_v8, 1.0 }
 0x188   :  { %v823_v46 = vpop.xlane.xlu0 %822  ;;  %v864_v5 = vmax.f32 %v848_v20, 1.0 }
 0x189   :  { %2509 = vrcp.f32 %v863_v15 }
 0x18a   :  { %2511 = vrcp.f32 %v860_v48 }
 0x18b   :  { %2513 = vrcp.f32 %v864_v5 }
 0x18c   :  { %2425 = vmatmul.mubr.msk.bf16.vlgmr.msra.gmra.mxu1 %vm790_vm3, %v3213_v55  ;;  %v826_v22 = vpop.xlane.xlu1 %825  ;;  %v829_v20 = vpop.xlane.xlu0 %828  ;;  %2515 = vrcp.f32 %v861_v12 }
 0x18d   :  { %2448 = vmatprep.mubr.msk.bf16.mxu1 %vm2571_vm10, %v3665_v6  ;;  %v851_v5 = vadd.f32 %v829_v20, %v3165_v40 }
 0x190   :  { %v832_v26 = vpop.xlane.xlu1 %831 }
 0x191   :  { %v852_v48 = vadd.f32 %v832_v26, %v3163_v11 }
 0x193   :  { %v868_v12 = vmax.f32 %v852_v48, 1.0  ;;  %v835_v20 = vpop.xlane.xlu0 %834 }
 0x224   :  { %v1110_v9 = vpop.f32.mrf.mxu1 }
 0x225   :  { %v1111_v13 = vadd.f32 %v1110_v9, %v1057_v17  ;;  %v846_v9 = vadd.f32 %v814_v34, %v3136_v1 }
 0x226   :  { %v2384_v19 = vpop.f32.mrf.mxu1 }
 0x227   :  { %v1425_v25 = vmul.f32 %v3317_v60, %v1111_v13  ;;  %v862_v34 = vmax.f32 %v846_v9, 1.0 }
 0x228   :  { %v1113_v30 = vpop.f32.mrf.mxu1 }
 0x229   :  { %v1114_v53 = vadd.f32 %v1113_v30, %v1058_v33  ;;  %v1448_v8 = vadd.f32 %v3326_v21, %v1425_v25  ;;  %v3337_v33 = vpop.eup %2503  ;;  %2517 = vrcp.f32 %v862_v34  ;;  %v1062_v34 = vmul.f32 %v3239_v39, %v3126_v54 }
 0x22a   :  { %v2385_v29 = vpop.f32.mrf.mxu1  ;;  %2519 = vrcp.f32 %v868_v12 }
 0x22b   :  { %v1426_v17 = vmul.f32 %v3329_v0, %v1114_v53  ;;  %v1464_v25 = vmax.f32 %v1448_v8, 0.0  ;;  %v849_v29 = vadd.f32 %v823_v46, %v3156_v18  ;;  %v1065_v8 = vmul.f32 %v3246_v47, %v3147_v62 }
 0x22c   :  { %v1154_v10 = vpop.f32.mrf.mxu1  ;;  %v850_v46 = vadd.f32 %v826_v22, %v3154_v7  ;;  %v867_v47 = vmax.f32 %v851_v5, 1.0 }
 0x22d   :  { %v1449_v13 = vadd.f32 %v3326_v21, %v1426_v17  ;;  %v1155_v19 = vadd.f32 %v1154_v10, %v1059_v63  ;;  %v3344_v10 = vpop.eup %2505 }
 0x22e   :  { %v2390_v15 = vpop.f32.mrf.mxu1 }
 0x22f   :  { %v1465_v30 = vmax.f32 %v1449_v13, 0.0  ;;  %v1427_v53 = vmul.f32 %v3337_v33, %v1155_v19 }
 0x230   :  { %v1157_v38 = vpop.f32.mrf.mxu1 }
 0x231   :  { %v1480_v63 = vpack.c.bf16 %v1465_v30, %v1464_v25  ;;  %v1158_v17 = vadd.f32 %v1157_v38, %v1060_v27  ;;  %v1450_v9 = vadd.f32 %v3326_v21, %v1427_v53  ;;  %v865_v27 = vmax.f32 %v849_v29, 1.0  ;;  %v3356_v38 = vpop.eup %2507 }
 0x232   :  { %v2391_v15 = vpop.f32.mrf.mxu1  ;;  %v1066_v29 = vmul.f32 %v3254_v52, %v3145_v61  ;;  %v1063_v52 = vmul.f32 %v3226_v36, %v3138_v57 }
 0x233   :  { %v1428_v26 = vmul.f32 %v3344_v10, %v1158_v17  ;;  %2430 = vmatprep.mubr.msk.bf16.mxu0 %vm790_vm3, %v1480_v63  ;;  %v3358_v17 = vpop.eup %2509  ;;  %v1466_v22 = vmax.f32 %v1450_v9, 0.0  ;;  %2521 = vrcp.f32 %v865_v27 }
 0x234   :  { %v1198_v13 = vpop.f32.mrf.mxu1  ;;  %v1286_v19 = vpop.f32.mrf.mxu0  ;;  %2523 = vrcp.f32 %v867_v47 }
 0x235   :  { %v1451_v25 = vadd.f32 %v3326_v21, %v1428_v26  ;;  %v1199_v37 = vadd.f32 %v1198_v13, %v1061_v32  ;;  %v1287_v30 = vadd.f32 %v1286_v19, %v1065_v8  ;;  %v866_v26 = vmax.f32 %v850_v46, 1.0  ;;  %v838_v19 = vpop.xlane.xlu1 %837  ;;  %v3367_v39 = vpop.eup %2511 }
 0x236   :  { %v2396_v53 = vpop.f32.mrf.mxu1  ;;  %v2408_v15 = vpop.f32.mrf.mxu0  ;;  %v853_v13 = vadd.f32 %v835_v20, %v3175_v14 }
 0x237   :  { %v1467_v48 = vmax.f32 %v1451_v25, 0.0  ;;  %v1429_v63 = vmul.f32 %v3356_v38, %v1199_v37  ;;  %v1433_v32 = vmul.f32 %v3358_v17, %v1287_v30  ;;  %v3369_v6 = vpop.eup %2513  ;;  %2525 = vrcp.f32 %v866_v26 }
 0x238   :  { %v1201_v8 = vpop.f32.mrf.mxu1  ;;  %v1289_v5 = vpop.f32.mrf.mxu0  ;;  %3706 = vst [vmem:[#allocation7_spill] sm:$0xff] %v3369_v6  ;;  %v869_v47 = vmax.f32 %v853_v13, 1.0 }
 0x239   :  { %v1481_v53 = vpack.c.bf16 %v1467_v48, %v1466_v22  ;;  %v1202_v15 = vadd.f32 %v1201_v8, %v1062_v34  ;;  %v1290_v9 = vadd.f32 %v1289_v5, %v1066_v29  ;;  %v1452_v46 = vadd.f32 %v3326_v21, %v1429_v63  ;;  %v3380_v29 = vpop.eup %2515 }
 0x23a   :  { %v2397_v25 = vpop.f32.mrf.mxu1  ;;  %v2409_v37 = vpop.f32.mrf.mxu0  ;;  %v1456_v27 = vadd.f32 %v3326_v21, %v1433_v32  ;;  %v854_v34 = vadd.f32 %v838_v19, %v3172_v50  ;;  %v1064_v8 = vmul.f32 %v3233_v28, %v3136_v1  ;;  %2527 = vrcp.f32 %v869_v47 }
 0x23b   :  { %v1430_v12 = vmul.f32 %v3367_v39, %v1202_v15  ;;  %2431 = vmatmul.mubr.msk.bf16.vlgmr.msra.gmra.mxu0 %vm790_vm3, %v1481_v53  ;;  %v1434_v20 = vmul.f32 %v3369_v6, %v1290_v9  ;;  %v1468_v26 = vmax.f32 %v1452_v46, 0.0  ;;  %v3386_v19 = vpop.eup %2517  ;;  %v1070_v28 = vmul.f32 %v3279_v4, %v3163_v11 }
 0x23c   :  { %v1242_v30 = vpop.f32.mrf.mxu1  ;;  %v1472_v15 = vmax.f32 %v1456_v27, 0.0  ;;  %3707 = vst [vmem:[#allocation8_spill] sm:$0xff] %v3386_v19  ;;  %v870_v25 = vmax.f32 %v854_v34, 1.0  ;;  %v1067_v27 = vmul.f32 %v3242_v41, %v3156_v18 }
 0x23d   :  { %v1453_v22 = vadd.f32 %v3326_v21, %v1430_v12  ;;  %v1243_v48 = vadd.f32 %v1242_v30, %v1063_v52  ;;  %v1457_v36 = vadd.f32 %v3326_v21, %v1434_v20  ;;  %v1069_v20 = vmul.f32 %v3268_v3, %v3165_v40 }
 0x23e   :  { %v2402_v63 = vpop.f32.mrf.mxu1  ;;  %v1374_v53 = vpop.f32.mrf.mxu0  ;;  %2529 = vrcp.f32 %v870_v25 }
 0x23f   :  { %v1469_v5 = vmax.f32 %v1453_v22, 0.0  ;;  %v1431_v32 = vmul.f32 %v3380_v29, %v1243_v48  ;;  %v1473_v13 = vmax.f32 %v1457_v36, 0.0  ;;  %v1375_v34 = vadd.f32 %v1374_v53, %v1069_v20 }
 0x240   :  { %v1245_v9 = vpop.f32.mrf.mxu1  ;;  %v2420_v52 = vpop.f32.mrf.mxu0 }
 0x241   :  { %v1482_v37 = vpack.c.bf16 %v1469_v5, %v1468_v26  ;;  %v1246_v12 = vadd.f32 %v1245_v9, %v1064_v8  ;;  %v1484_v46 = vpack.c.bf16 %v1473_v13, %v1472_v15  ;;  %v1454_v22 = vadd.f32 %v3326_v21, %v1431_v32  ;;  %v3397_v8 = vpop.eup %2519 }
 0x242   :  { %v2403_v30 = vpop.f32.mrf.mxu1  ;;  %v1377_v47 = vpop.f32.mrf.mxu0  ;;  %3708 = vst [vmem:[#allocation9_spill] sm:$0xff] %v3397_v8  ;;  %v1068_v13 = vmul.f32 %v3248_v51, %v3154_v7 }
 0x243   :  { %v1432_v48 = vmul.f32 %v3386_v19, %v1246_v12  ;;  %2434 = vmatprep.mubr.msk.bf16.mxu0 %vm790_vm3, %v1482_v37  ;;  %v1378_v36 = vadd.f32 %v1377_v47, %v1070_v28  ;;  %v3400_v5 = vpop.eup %2521  ;;  %v1470_v53 = vmax.f32 %v1454_v22, 0.0 }
 0x244   :  { %v1330_v63 = vpop.f32.mrf.mxu1  ;;  %v2421_v4 = vpop.f32.mrf.mxu0  ;;  %3709 = vst [vmem:[#allocation10_spill] sm:$0xff] %v3400_v5 }
 0x245   :  { %v1455_v3 = vadd.f32 %v3326_v21, %v1432_v48  ;;  %v1331_v26 = vadd.f32 %v1330_v63, %v1067_v27  ;;  %v1438_v41 = vmul.f32 %v3397_v8, %v1378_v36  ;;  %v3403_v15 = vpop.eup %2523  ;;  %v1071_v48 = vmul.f32 %v3262_v2, %v3175_v14 }
 0x246   :  { %v2414_v32 = vpop.f32.mrf.mxu1  ;;  %3710 = vst [vmem:[#allocation11_spill] sm:$0xff] %v3403_v15  ;;  %v1437_v25 = vmul.f32 %v3403_v15, %v1375_v34  ;;  %v3409_v12 = vpop.eup %2525  ;;  %v1072_v2 = vmul.f32 %v3275_v59, %v3172_v50 }
 0x247   :  { %v1471_v9 = vmax.f32 %v1455_v3, 0.0  ;;  %v1435_v37 = vmul.f32 %v3400_v5, %v1331_v26  ;;  %3711 = vst [vmem:[#allocation12_spill] sm:$0xff] %v3409_v12  ;;  %v1461_v30 = vadd.f32 %v3326_v21, %v1438_v41  ;;  %v3420_v3 = vpop.eup %2527 }
 0x248   :  { %v1333_v52 = vpop.f32.mrf.mxu1  ;;  %v1460_v22 = vadd.f32 %v3326_v21, %v1437_v25  ;;  %3712 = vst [vmem:[#allocation13_spill] sm:$0xff] %v3420_v3 }
 0x249   :  { %v1483_v20 = vpack.c.bf16 %v1471_v9, %v1470_v53  ;;  %v1334_v28 = vadd.f32 %v1333_v52, %v1068_v13  ;;  %v1458_v47 = vadd.f32 %v3326_v21, %v1435_v37  ;;  %v1477_v4 = vmax.f32 %v1461_v30, 0.0 }
 0x24a   :  { %v2415_v27 = vpop.f32.mrf.mxu1  ;;  %v1476_v53 = vmax.f32 %v1460_v22, 0.0 }
 0x24b   :  { %v1436_v51 = vmul.f32 %v3409_v12, %v1334_v28  ;;  %2435 = vmatmul.mubr.msk.bf16.gmra.mxu0 %vm790_vm3, %v1483_v20  ;;  %v1474_v41 = vmax.f32 %v1458_v47, 0.0  ;;  %v3425_v52 = vpop.eup %2529 }
 0x24c   :  { %v1418_v34 = vpop.f32.mrf.mxu1  ;;  %2438 = vmatprep.mubr.msk.bf16.mxu0 %vm790_vm3, %v1484_v46  ;;  %3713 = vst [vmem:[#allocation14_spill] sm:$0xff] %v3425_v52  ;;  %v1486_v46 = vpack.c.bf16 %v1477_v4, %v1476_v53 }
 0x24d   :  { %v1459_v36 = vadd.f32 %v3326_v21, %v1436_v51  ;;  %v1419_v63 = vadd.f32 %v1418_v34, %v1071_v48  ;;  %v3714_v51 = vmov 0.0  }
 0x24e   :  { %v2426_v26 = vpop.f32.mrf.mxu1 }
 0x24f   :  { %v1475_v32 = vmax.f32 %v1459_v36, 0.0  ;;  %v1439_v13 = vmul.f32 %v3420_v3, %v1419_v63 }
 0x250   :  { %v1421_v9 = vpop.f32.mrf.mxu1 }
 0x251   :  { %v1485_v37 = vpack.c.bf16 %v1475_v32, %v1474_v41  ;;  %v1422_v25 = vadd.f32 %v1421_v9, %v1072_v2  ;;  %v1462_v28 = vadd.f32 %v3326_v21, %v1439_v13 }
 0x252   :  { %v2427_v20 = vpop.f32.mrf.mxu1 }
 0x253   :  { %v1440_v30 = vmul.f32 %v3425_v52, %v1422_v25  ;;  %2439 = vmatmul.mubr.msk.bf16.gmra.mxu0 %vm790_vm3, %v1485_v37  ;;  %v1478_v27 = vmax.f32 %v1462_v28, 0.0 }
 0x254   :  { %2442 = vmatprep.mubr.msk.bf16.mxu0 %vm790_vm3, %v1486_v46 }
 0x255   :  { %v1463_v59 = vadd.f32 %v3326_v21, %v1440_v30 }
 0x257   :  { %v1479_v48 = vmax.f32 %v1463_v59, 0.0 }
 0x259   :  { %v1487_v47 = vpack.c.bf16 %v1479_v48, %v1478_v27  ;;  %v2016_v27 = vadd.f32 %v3116_v45, %v3112_v43 }
 0x25b   :  { %2443 = vmatmul.mubr.msk.bf16.gmra.mxu0 %vm790_vm3, %v1487_v47  ;;  %v2017_v47 = vrot.slane %v2016_v27, 4 }
 0x25c   :  { %2472 = vmatprep.mubr.msk.bf16.mxu0 %vm2571_vm10, %v3714_v51 }
 0x2fb   :  { %v3435_v22 = vpop.f32.mrf.mxu0 }
 0x2fd   :  { %v3437_v34 = vpop.f32.mrf.mxu0 }
 0x2ff   :  { %v3439_v36 = vpop.f32.mrf.mxu0 }
 0x300   :  { %v1610_v21 = vpack.c.bf16 %v3439_v36, %v3435_v22 }
 0x301   :  { %v3441_v63 = vpop.f32.mrf.mxu0 }
 0x302   :  { %v1609_v4 = vpack.c.bf16 %v3441_v63, %v3437_v34 }
 0x304   :  { %2447 = vmatpush3.bf16.msra.mxu1 %v1609_v4 }
 0x305   :  { %2452 = vmatprep.subr.bf16.mxu1 %v3714_v51 }
 0x307   :  { %2449 = vmatmul.mubr.msk.bf16.vlgmr.msra.gmra.mxu1 %vm790_vm3, %v3185_v24 }
 0x308   :  { %2453 = vmatpush3.bf16.msra.mxu1 %v1610_v21  ;;  %2454 = vmatprep.mubr.msk.bf16.mxu1 %vm2571_vm10, %v3714_v51 }
 0x309   :  { %2458 = vmatprep.subr.bf16.mxu1 %v3714_v51 }
 0x30b   :  { %v3453_v26 = vpop.f32.mrf.mxu0 }
 0x30d   :  { %v3455_v2 = vpop.f32.mrf.mxu0 }
 0x30f   :  { %v3457_v41 = vpop.f32.mrf.mxu0  ;;  %2455 = vmatmul.mubr.msk.bf16.vlgmr.msra.gmra.mxu1 %vm790_vm3, %v3189_v31 }
 0x310   :  { %2460 = vmatprep.mubr.msk.bf16.mxu1 %vm2571_vm10, %v3714_v51  ;;  %v1612_v9 = vpack.c.bf16 %v3457_v41, %v3453_v26 }
 0x311   :  { %v3463_v32 = vpop.f32.mrf.mxu0 }
 0x312   :  { %v1611_v24 = vpack.c.bf16 %v3463_v32, %v3455_v2 }
 0x313   :  { %v3467_v13 = vpop.f32.mrf.mxu0 }
 0x314   :  { %2459 = vmatpush3.bf16.msra.mxu1 %v1611_v24  ;;  %v2058_v24 = vadd.f32 %v3163_v11, %v3165_v40 }
 0x315   :  { %v3469_v53 = vpop.f32.mrf.mxu0  ;;  %2464 = vmatprep.subr.bf16.mxu1 %v3714_v51 }
 0x316   :  { %v2059_v3 = vrot.slane %v2058_v24, 4 }
 0x317   :  { %v3474_v37 = vpop.f32.mrf.mxu0  ;;  %2461 = vmatmul.mubr.msk.bf16.vlgmr.msra.gmra.mxu1 %vm790_vm3, %v3193_v23 }
 0x318   :  { %2465 = vmatpush3.bf16.msra.mxu1 %v1612_v9  ;;  %2466 = vmatprep.mubr.msk.bf16.mxu1 %vm2571_vm10, %v3714_v51  ;;  %v1614_v23 = vpack.c.bf16 %v3474_v37, %v3467_v13  ;;  %v2018_v9 = vadd.f32 %v2017_v47, %v2016_v27  ;;  %v2060_v6 = vadd.f32 %v2059_v3, %v2058_v24 }
 0x319   :  { %v3480_v31 = vpop.f32.mrf.mxu0  ;;  %2476 = vmatprep.subr.bf16.mxu1 %v3714_v51  ;;  %v2065_v47 = vadd.f32 %v3172_v50, %v3175_v14 }
 0x31a   :  { %v1613_v25 = vpack.c.bf16 %v3480_v31, %v3469_v53 }
 0x31b   :  { %v3485_v46 = vpop.f32.mrf.mxu0 }
 0x31c   :  { %2471 = vmatpush3.bf16.msra.mxu0 %v1613_v25 }
 0x31d   :  { %v3487_v20 = vpop.f32.mrf.mxu0  ;;  %2482 = vmatprep.subr.bf16.mxu0 %v3714_v51 }
 0x31e   :  { %3715 = vst [vmem:[#allocation15_spill] sm:$0xff] %v3487_v20 }
 0x31f   :  { %v3492_v28 = vpop.f32.mrf.mxu0  ;;  %2467 = vmatmul.mubr.msk.bf16.vlgmr.msra.gmra.mxu1 %vm790_vm3, %v3197_v49  ;;  %2473 = vmatmul.mubr.msk.bf16.vlgmr.msra.gmra.mxu0 %vm790_vm3, %v3201_v58  ;;  %v2023_v58 = vadd.f32 %v3114_v44, %v3110_v42 }
 0x320   :  { %3716 = vst [vmem:[#allocation16_spill] sm:$0xff] %v3492_v28  ;;  %2477 = vmatpush3.bf16.msra.mxu1 %v1614_v23  ;;  %2478 = vmatprep.mubr.msk.bf16.mxu1 %vm2571_vm10, %v3714_v51  ;;  %v1616_v49 = vpack.c.bf16 %v3492_v28, %v3485_v46  ;;  %v2019_v28 = vrot.slane %v2018_v9, 2 }
 0x321   :  { %v3500_v30 = vpop.f32.mrf.mxu0  ;;  %2484 = vmatprep.mubr.msk.bf16.mxu0 %vm2571_vm10, %v3714_v51  ;;  %2488 = vmatprep.subr.bf16.mxu1 %v3714_v51  ;;  %v2024_v48 = vrot.slane %v2023_v58, 4 }
 0x322   :  { %3717 = vst [vmem:[#allocation17_spill] sm:$0xff] %v3500_v30  ;;  %v1615_v59 = vpack.c.bf16 %v3500_v30, %v3487_v20  ;;  %v2020_v11 = vadd.f32 %v2019_v28, %v2018_v9  ;;  %v2061_v28 = vrot.slane %v2060_v6, 2 }
 0x323   :  { %v2025_v4 = vadd.f32 %v2024_v48, %v2023_v58  ;;  %v1617_v58 = vmul.f32 %v3437_v34, %v3112_v43  ;;  %v1618_v34 = vmul.f32 %v3441_v63, %v3116_v45 }
 0x324   :  { %2483 = vmatpush3.bf16.msra.mxu0 %v1615_v59  ;;  %v2021_v9 = vrot.slane %v2020_v11, 1 }
 0x325   :  { %v2026_v59 = vrot.slane %v2025_v4, 2 }
 0x327   :  { %2479 = vmatmul.mubr.msk.bf16.vlgmr.msra.gmra.mxu1 %vm790_vm3, %v3206_v35  ;;  %2485 = vmatmul.mubr.msk.bf16.vlgmr.msra.gmra.mxu0 %vm790_vm3, %v3209_v16  ;;  %v2030_v35 = vadd.f32 %v3126_v54, %v3128_v56  ;;  %v2037_v16 = vadd.f32 %v3136_v1, %v3138_v57  ;;  %v2027_v48 = vadd.f32 %v2026_v59, %v2025_v4 }
 0x328   :  { %2489 = vmatpush3.bf16.msra.mxu1 %v1616_v49  ;;  %2490 = vmatprep.mubr.msk.bf16.mxu1 %vm2571_vm10, %v3714_v51  ;;  %v2044_v51 = vadd.f32 %v3145_v61, %v3147_v62  ;;  %vm2178_vm10 = vcmask 1042434  }
 0x329   :  { %v2031_v21 = vrot.slane %v2030_v35, 4  ;;  %v2038_v25 = vrot.slane %v2037_v16, 4  ;;  %v2028_v3 = vrot.slane %v2027_v48, 1 }
 0x32a   :  { %v2045_v23 = vrot.slane %v2044_v51, 4 }
 0x32b   :  { %v2032_v49 = vadd.f32 %v2031_v21, %v2030_v35  ;;  %v2039_v8 = vadd.f32 %v2038_v25, %v2037_v16  ;;  %v3538_v35 = vld [vmem:[%s3663_s5] ss:$0 sm:$0xff]  ;;  %v2029_v50 = vadd.f32 %v2028_v3, %v2027_v48  ;;  %s2572_s5 = smov [#allocation2]  }
 0x32c   :  { %v2046_v12 = vadd.f32 %v2045_v23, %v2044_v51  ;;  %v2066_v23 = vrot.slane %v2065_v47, 4  ;;  %s2198_s26 = sshll.u32 %s2572_s5, 4  ;;  %s2199_s26 = int_to_ptr.vmem [resolvable:$true] %s2198_s26 }
 0x32d   :  { %v2033_v15 = vrot.slane %v2032_v49, 2  ;;  %v2040_v27 = vrot.slane %v2039_v8, 2  ;;  %s2547_s27 = scalar_lea.vmem %s2199_s26, 128  ;;  %p2552_p1 = scmp.lt.s32.totalorder %s2199_s26, %s2199_s26 }
 0x32e   :  { %v2047_v51 = vrot.slane %v2046_v12, 2  ;;  %p2548_p0 = scmp.ne.s32.totalorder %s2199_s26, %s2547_s27  ;;  %p2553_p2 = scmp.lt.s32.totalorder %s2547_s27, %s2547_s27 }
 0x32f   :  { %2491 = vmatmul.mubr.msk.bf16.vlgmr.msra.gmra.mxu1 %vm790_vm3, %v3213_v55  ;;  %v2051_v55 = vadd.f32 %v3154_v7, %v3156_v18  ;;  %v2034_v4 = vadd.f32 %v2033_v15, %v2032_v49  ;;  %v2041_v25 = vadd.f32 %v2040_v27, %v2039_v8  ;;  %v2062_v15 = vadd.f32 %v2061_v28, %v2060_v6 }
 0x330   :  { %v2067_v27 = vadd.f32 %v2066_v23, %v2065_v47  ;;  %p2554_p3 = por %p2553_p2, %p2552_p1 }
 0x331   :  { %v2052_v52 = vrot.slane %v2051_v55, 4  ;;  %v2042_v8 = vrot.slane %v2041_v25, 1  ;;  %v2063_v3 = vrot.slane %v2062_v15, 1 }
 0x332   :  { %p2555_p4 = pnand %p2554_p3, %p2548_p0 }
 0x333   :  { %v2053_v5 = vadd.f32 %v2052_v52, %v2051_v55 }
 0x3c7   :  { %v1667_v30 = vpop.f32.mrf.mxu1 }
 0x3c8   :  { %v1668_v19 = vadd.f32 %v1667_v30, %v1617_v58  ;;  %v2054_v30 = vrot.slane %v2053_v5, 2  ;;  %v2048_v58 = vadd.f32 %v2047_v51, %v2046_v12 }
 0x3c9   :  { %v2450_v16 = vpop.f32.mrf.mxu1 }
 0x3ca   :  { %v1961_v52 = vmul.f32 %v3317_v60, %v1668_v19  ;;  %v1619_v16 = vmul.f32 %v3435_v22, %v3110_v42  ;;  %v2035_v60 = vrot.slane %v2034_v4, 1  ;;  %v2055_v19 = vadd.f32 %v2054_v30, %v2053_v5 }
 0x3cb   :  { %v1670_v21 = vpop.f32.mrf.mxu1  ;;  %v2049_v12 = vrot.slane %v2048_v58, 1  ;;  %v1620_v22 = vmul.f32 %v3439_v36, %v3114_v44  ;;  %v2073_v5 = vmax.f32 %v2029_v50, 1.0  ;;  %v1621_v50 = vmul.f32 %v3455_v2, %v3128_v56 }
 0x3cc   :  { %v1984_v55 = vadd.f32 %v3538_v35, %v1961_v52  ;;  %v1671_v24 = vadd.f32 %v1670_v21, %v1618_v34  ;;  %v2022_v21 = vadd.f32 %v2021_v9, %v2020_v11  ;;  %v2036_v6 = vadd.f32 %v2035_v60, %v2034_v4 }
 0x3cd   :  { %v2451_v59 = vpop.f32.mrf.mxu1  ;;  %v2056_v51 = vrot.slane %v2055_v19, 1  ;;  %v2068_v9 = vrot.slane %v2067_v27, 2  ;;  %2531 = vrcp.f32 %v2073_v5 }
 0x3ce   :  { %v1962_v63 = vmul.f32 %v3329_v0, %v1671_v24  ;;  %v2000_v20 = vmul.f32 %v1984_v55, %v3112_v43  ;;  %v2072_v55 = vmax.f32 %v2022_v21, 1.0  ;;  %v2043_v24 = vadd.f32 %v2042_v8, %v2041_v25 }
 0x3cf   :  { %v1708_v49 = vpop.f32.mrf.mxu1  ;;  %v2074_v4 = vmax.f32 %v2036_v6, 1.0  ;;  %v2069_v21 = vadd.f32 %v2068_v9, %v2067_v27 }
 0x3d0   :  { %v1985_v52 = vadd.f32 %v3538_v35, %v1962_v63  ;;  %v1709_v34 = vadd.f32 %v1708_v49, %v1619_v16  ;;  %v2080_v30 = vsel %vm413_vm13, %v2000_v20, 0.0  ;;  %v2057_v16 = vadd.f32 %v2056_v51, %v2055_v19 }
 0x3d1   :  { %v2456_v59 = vpop.f32.mrf.mxu1  ;;  %v2064_v63 = vadd.f32 %v2063_v3, %v2062_v15  ;;  %2533 = vrcp.f32 %v2072_v55  ;;  %v2070_v6 = vrot.slane %v2069_v21, 1 }
 0x3d2   :  { %v2001_v0 = vmul.f32 %v1985_v52, %v3116_v45  ;;  %v1963_v48 = vmul.f32 %v3337_v33, %v1709_v34  ;;  %v2050_v45 = vadd.f32 %v2049_v12, %v2048_v58  ;;  %v2075_v34 = vmax.f32 %v2043_v24, 1.0 }
 0x3d3   :  { %v1711_v43 = vpop.f32.mrf.mxu1  ;;  %2535 = vrcp.f32 %v2074_v4  ;;  %v2077_v15 = vmax.f32 %v2057_v16, 1.0  ;;  %v2078_v12 = vmax.f32 %v2064_v63, 1.0  ;;  %v1626_v63 = vmul.f32 %v3480_v31, %v3145_v61 }
 0x3d4   :  { %v2081_v11 = vsel %vm413_vm13, %v2001_v0, 0.0  ;;  %v1986_v47 = vadd.f32 %v3538_v35, %v1963_v48  ;;  %v1712_v28 = vadd.f32 %v1711_v43, %v1620_v22  ;;  %v2076_v59 = vmax.f32 %v2050_v45, 1.0 }
 0x3d5   :  { %v2082_v36 = vadd.f32 %v2081_v11, %v2080_v30  ;;  %v2457_v23 = vpop.f32.mrf.mxu1  ;;  %2537 = vrcp.f32 %v2075_v34 }
 0x3d6   :  { %v1964_v33 = vmul.f32 %v3344_v10, %v1712_v28  ;;  %v2002_v49 = vmul.f32 %v1986_v47, %v3110_v42  ;;  %v1622_v10 = vmul.f32 %v3463_v32, %v3126_v54  ;;  %2539 = vrcp.f32 %v2076_v59 }
 0x3d7   :  { %v2083_v20 = vrot.slane %v2082_v36, 4  ;;  %v1749_v60 = vpop.f32.mrf.mxu1  ;;  %2541 = vrcp.f32 %v2077_v15  ;;  %v3575_v23 = vadd.f32 %v2070_v6, %v2069_v21 }
 0x3d8   :  { %v1987_v52 = vadd.f32 %v3538_v35, %v1964_v33  ;;  %v1750_v25 = vadd.f32 %v1749_v60, %v1621_v50  ;;  %v2089_v0 = vsel %vm413_vm13, %v2002_v49, 0.0  ;;  %2543 = vrcp.f32 %v2078_v12  ;;  %v3719_v12 = vld [vmem:[#allocation8_spill] sm:$0xff] }
 0x3d9   :  { %v2084_v58 = vadd.f32 %v2083_v20, %v2082_v36  ;;  %v2462_v8 = vpop.f32.mrf.mxu1 }
 0x3da   :  { %v2003_v2 = vmul.f32 %v1987_v52, %v3114_v44  ;;  %v1965_v19 = vmul.f32 %v3356_v38, %v1750_v25  ;;  %v1623_v44 = vmul.f32 %v3453_v26, %v3138_v57  ;;  %v1625_v38 = vmul.f32 %v3469_v53, %v3147_v62  ;;  %v2532_v34 = vpop.eup %2531 }
 0x3db   :  { %v2085_v42 = vrot.slane %v2084_v58, 2  ;;  %v1752_v22 = vpop.f32.mrf.mxu1  ;;  %v1624_v26 = vmul.f32 %v3457_v41, %v3136_v1 }
 0x3dc   :  { %v2090_v48 = vsel %vm413_vm13, %v2003_v2, 0.0  ;;  %v1988_v27 = vadd.f32 %v3538_v35, %v1965_v19  ;;  %v1753_v5 = vadd.f32 %v1752_v22, %v1622_v10  ;;  %v3718_v10 = vld [vmem:[#allocation15_spill] sm:$0xff]  ;;  %v3720_v22 = vld [vmem:[#allocation5_spill] sm:$0xff] }
 0x3dd   :  { %v2086_v51 = vadd.f32 %v2085_v42, %v2084_v58  ;;  %v2091_v32 = vadd.f32 %v2090_v48, %v2089_v0  ;;  %v2463_v3 = vpop.f32.mrf.mxu1  ;;  %v1629_v2 = vmul.f32 %v3718_v10, %v3165_v40  ;;  %v3721_v0 = vld [vmem:[#allocation17_spill] sm:$0xff] }
 0x3de   :  { %v1966_v43 = vmul.f32 %v3367_v39, %v1753_v5  ;;  %v2004_v47 = vmul.f32 %v1988_v27, %v3128_v56  ;;  %v1627_v39 = vmul.f32 %v3467_v13, %v3156_v18  ;;  %v1628_v56 = vmul.f32 %v3474_v37, %v3154_v7  ;;  %v2534_v59 = vpop.eup %2533  ;;  %v3722_v5 = vld [vmem:[#allocation7_spill] sm:$0xff] }
 0x3df   :  { %v2087_v30 = vrot.slane %v2086_v51, 1  ;;  %v2092_v11 = vrot.slane %v2091_v32, 4  ;;  %v1790_v28 = vpop.f32.mrf.mxu1  ;;  %v1831_v55 = vpop.f32.mrf.mxu0  ;;  %v1630_v48 = vmul.f32 %v3721_v0, %v3720_v22  ;;  %v3728_v0 = vld [vmem:[#allocation16_spill] sm:$0xff] }
 0x3e0   :  { %v1989_v24 = vadd.f32 %v3538_v35, %v1966_v43  ;;  %v1791_v9 = vadd.f32 %v1790_v28, %v1623_v44  ;;  %v1832_v36 = vadd.f32 %v1831_v55, %v1625_v38  ;;  %v2098_v60 = vsel %vm413_vm13, %v2004_v47, 0.0  ;;  %v2536_v3 = vpop.eup %2535 }
 0x3e1   :  { %v2093_v53 = vadd.f32 %v2092_v11, %v2091_v32  ;;  %v2468_v45 = vpop.f32.mrf.mxu1  ;;  %v2474_v50 = vpop.f32.mrf.mxu0  ;;  %v2088_v20 = vadd.f32 %v2087_v30, %v2086_v51 }
 0x3e2   :  { %v2005_v33 = vmul.f32 %v1989_v24, %v3126_v54  ;;  %v1967_v4 = vmul.f32 %v3380_v29, %v1791_v9  ;;  %v1969_v16 = vmul.f32 %v3358_v17, %v1832_v36  ;;  %v3594_v17 = vmul.f32 %v3485_v46, %v3175_v14  ;;  %v3606_v55 = vpop.eup %2537 }
 0x3e3   :  { %v2094_v41 = vrot.slane %v2093_v53, 2  ;;  %v1793_v13 = vpop.f32.mrf.mxu1  ;;  %v1834_v49 = vpop.f32.mrf.mxu0  ;;  %v2153_v44 = vmul.f32 %v2534_v59, %v2088_v20  ;;  %v3726_v59 = vld [vmem:[#allocation9_spill] sm:$0xff] }
 0x3e4   :  { %v2099_v52 = vsel %vm413_vm13, %v2005_v33, 0.0  ;;  %v1990_v25 = vadd.f32 %v3538_v35, %v1967_v4  ;;  %v1992_v37 = vadd.f32 %v3538_v35, %v1969_v16  ;;  %v1794_v54 = vadd.f32 %v1793_v13, %v1624_v26  ;;  %v3723_v26 = vld [vmem:[#allocation10_spill] sm:$0xff]  ;;  %v3612_v45 = vpop.eup %2539  ;;  %v3724_v4 = vld [vmem:[#allocation11_spill] sm:$0xff] }
 0x3e5   :  { %v2095_v29 = vadd.f32 %v2094_v41, %v2093_v53  ;;  %v2100_v31 = vadd.f32 %v2099_v52, %v2098_v60  ;;  %v1835_v21 = vadd.f32 %v1834_v49, %v1626_v63  ;;  %v2469_v58 = vpop.f32.mrf.mxu1  ;;  %v2475_v8 = vpop.f32.mrf.mxu0 }
 0x3e6   :  { %v2006_v19 = vmul.f32 %v1990_v25, %v3138_v57  ;;  %v2008_v15 = vmul.f32 %v1992_v37, %v3147_v62  ;;  %v1968_v42 = vmul.f32 %v3719_v12, %v1794_v54  ;;  %v3616_v41 = vpop.eup %2541  ;;  %v3725_v58 = vld [vmem:[#allocation12_spill] sm:$0xff] }
 0x3e7   :  { %v2096_v46 = vrot.slane %v2095_v29, 1  ;;  %v2101_v27 = vrot.slane %v2100_v31, 4  ;;  %v1970_v6 = vmul.f32 %v3722_v5, %v1835_v21  ;;  %v1872_v51 = vpop.f32.mrf.mxu1  ;;  %v1913_v32 = vpop.f32.mrf.mxu0 }
 0x3e8   :  { %v1991_v38 = vadd.f32 %v3538_v35, %v1968_v42  ;;  %v1873_v43 = vadd.f32 %v1872_v51, %v1627_v39  ;;  %v1914_v11 = vadd.f32 %v1913_v32, %v1629_v2  ;;  %v2107_v24 = vsel %vm413_vm13, %v2006_v19, 0.0  ;;  %v3620_v52 = vpop.eup %2543  ;;  %v3727_v42 = vld [vmem:[#allocation6_spill] sm:$0xff] }
 0x3e9   :  { %v2097_v57 = vadd.f32 %v2096_v46, %v2095_v29  ;;  %v2102_v30 = vadd.f32 %v2101_v27, %v2100_v31  ;;  %v1993_v62 = vadd.f32 %v3538_v35, %v1970_v6  ;;  %v2480_v47 = vpop.f32.mrf.mxu1  ;;  %v2486_v28 = vpop.f32.mrf.mxu0  ;;  %v2116_v9 = vsel %vm413_vm13, %v2008_v15, 0.0 }
 0x3ea   :  { %v2007_v36 = vmul.f32 %v1991_v38, %v3136_v1  ;;  %v1971_v53 = vmul.f32 %v3723_v26, %v1873_v43  ;;  %v1973_v16 = vmul.f32 %v3724_v4, %v1914_v11  ;;  %v3729_v11 = vld [vmem:[#allocation13_spill] sm:$0xff] }
 0x3eb   :  { %v2155_v39 = vmul.f32 %v2532_v34, %v2097_v57  ;;  %v2103_v50 = vrot.slane %v2102_v30, 2  ;;  %v2009_v33 = vmul.f32 %v1993_v62, %v3145_v61  ;;  %v1875_v63 = vpop.f32.mrf.mxu1  ;;  %v1916_v20 = vpop.f32.mrf.mxu0 }
 0x3ec   :  { %v2108_v60 = vsel %vm413_vm13, %v2007_v36, 0.0  ;;  %v1994_v13 = vadd.f32 %v3538_v35, %v1971_v53  ;;  %v1876_v49 = vadd.f32 %v1875_v63, %v1628_v56  ;;  %v1917_v1 = vadd.f32 %v1916_v20, %v1630_v48 }
 0x3ed   :  { %v2104_v25 = vadd.f32 %v2103_v50, %v2102_v30  ;;  %v2109_v37 = vadd.f32 %v2108_v60, %v2107_v24  ;;  %v2117_v54 = vsel %vm413_vm13, %v2009_v33, 0.0  ;;  %v1996_v61 = vadd.f32 %v3538_v35, %v1973_v16  ;;  %v2481_v34 = vpop.f32.mrf.mxu1  ;;  %v2487_v29 = vpop.f32.mrf.mxu0 }
 0x3ee   :  { %v2118_v31 = vadd.f32 %v2117_v54, %v2116_v9  ;;  %v2010_v21 = vmul.f32 %v1994_v13, %v3156_v18  ;;  %v1972_v8 = vmul.f32 %v3725_v58, %v1876_v49  ;;  %v1974_v10 = vmul.f32 %v3726_v59, %v1917_v1 }
 0x3ef   :  { %v2105_v2 = vrot.slane %v2104_v25, 1  ;;  %v2110_v56 = vrot.slane %v2109_v37, 4  ;;  %v2012_v19 = vmul.f32 %v1996_v61, %v3165_v40  ;;  %v1954_v15 = vpop.f32.mrf.mxu1  ;;  %v2177_v12 = vsel %vm2176_vm0, %v2155_v39, %v2153_v44 }
 0x3f0   :  { %v1632_v48 = vmul.f32 %v3728_v0, %v3727_v42  ;;  %v2119_v46 = vrot.slane %v2118_v31, 4  ;;  %v1995_v27 = vadd.f32 %v3538_v35, %v1972_v8  ;;  %v1997_v5 = vadd.f32 %v3538_v35, %v1974_v10 }
 0x3f1   :  { %v2106_v18 = vadd.f32 %v2105_v2, %v2104_v25  ;;  %v2111_v6 = vadd.f32 %v2110_v56, %v2109_v37  ;;  %v1955_v51 = vadd.f32 %v1954_v15, %v3594_v17  ;;  %v2492_v32 = vpop.f32.mrf.mxu1  ;;  %v2125_v40 = vsel %vm413_vm13, %v2010_v21, 0.0 }
 0x3f2   :  { %v2120_v38 = vadd.f32 %v2119_v46, %v2118_v31  ;;  %v2011_v43 = vmul.f32 %v1995_v27, %v3154_v7  ;;  %v2013_v44 = vmul.f32 %v1997_v5, %v3720_v22  ;;  %v2134_v62 = vsel %vm413_vm13, %v2012_v19, 0.0 }
 0x3f3   :  { %v2157_v57 = vmul.f32 %v2536_v3, %v2106_v18  ;;  %v2112_v30 = vrot.slane %v2111_v6, 2  ;;  %v1975_v47 = vmul.f32 %v3729_v11, %v1955_v51  ;;  %v1957_v28 = vpop.f32.mrf.mxu1  ;;  %v3730_v3 = vld [vmem:[#allocation14_spill] sm:$0xff]  ;;  %v2079_v60 = vmax.f32 %v3575_v23, 1.0 }
 0x3f4   :  { %v2121_v24 = vrot.slane %v2120_v38, 2  ;;  %v2126_v9 = vsel %vm413_vm13, %v2011_v43, 0.0  ;;  %v2135_v17 = vsel %vm413_vm13, %v2013_v44, 0.0  ;;  %v1958_v36 = vadd.f32 %v1957_v28, %v1632_v48 }
 0x3f5   :  { %v2113_v26 = vadd.f32 %v2112_v30, %v2111_v6  ;;  %v2127_v53 = vadd.f32 %v2126_v9, %v2125_v40  ;;  %v2136_v39 = vadd.f32 %v2135_v17, %v2134_v62  ;;  %v1998_v7 = vadd.f32 %v3538_v35, %v1975_v47  ;;  %v2493_v50 = vpop.f32.mrf.mxu1 }
 0x3f6   :  { %v2122_v22 = vadd.f32 %v2121_v24, %v2120_v38  ;;  %v1976_v33 = vmul.f32 %v3730_v3, %v1958_v36  ;;  %v2179_v4 = vsel %vm2178_vm10, %v2157_v57, %v2177_v12  ;;  %2545 = vrcp.f32 %v2079_v60 }
 0x3f7   :  { %v2114_v16 = vrot.slane %v2113_v26, 1  ;;  %v2128_v63 = vrot.slane %v2127_v53, 4  ;;  %v2137_v20 = vrot.slane %v2136_v39, 4  ;;  %v2014_v49 = vmul.f32 %v1998_v7, %v3175_v14 }
 0x3f8   :  { %v2123_v13 = vrot.slane %v2122_v22, 1  ;;  %v1999_v1 = vadd.f32 %v3538_v35, %v1976_v33 }
 0x3f9   :  { %v2115_v25 = vadd.f32 %v2114_v16, %v2113_v26  ;;  %v2129_v37 = vadd.f32 %v2128_v63, %v2127_v53  ;;  %v2138_v54 = vadd.f32 %v2137_v20, %v2136_v39  ;;  %v2143_v23 = vsel %vm413_vm13, %v2014_v49, 0.0 }
 0x3fa   :  { %v2124_v61 = vadd.f32 %v2123_v13, %v2122_v22  ;;  %v2015_v34 = vmul.f32 %v1999_v1, %v3727_v42 }
 0x3fb   :  { %v2130_v29 = vrot.slane %v2129_v37, 2  ;;  %v2139_v31 = vrot.slane %v2138_v54, 2  ;;  %v2159_v21 = vmul.f32 %v3606_v55, %v2115_v25 }
 0x3fc   :  { %v2144_v58 = vsel %vm413_vm13, %v2015_v34, 0.0  ;;  %v2161_v14 = vmul.f32 %v3612_v45, %v2124_v61 }
 0x3fd   :  { %v2131_v35 = vadd.f32 %v2130_v29, %v2129_v37  ;;  %v2145_v8 = vadd.f32 %v2144_v58, %v2143_v23  ;;  %v2140_v59 = vadd.f32 %v2139_v31, %v2138_v54  ;;  %v2181_v10 = vsel %vm2180_vm6, %v2159_v21, %v2179_v4 }
 0x3fe   :  { %v2183_v2 = vsel %vm2182_vm8, %v2161_v14, %v2181_v10 }
 0x3ff   :  { %v2132_v56 = vrot.slane %v2131_v35, 1  ;;  %v2146_v19 = vrot.slane %v2145_v8, 4  ;;  %v2141_v15 = vrot.slane %v2140_v59, 1 }
 0x401   :  { %v2147_v12 = vadd.f32 %v2146_v19, %v2145_v8  ;;  %v2133_v42 = vadd.f32 %v2132_v56, %v2131_v35  ;;  %v2142_v0 = vadd.f32 %v2141_v15, %v2140_v59 }
 0x403   :  { %v2148_v55 = vrot.slane %v2147_v12, 2  ;;  %v2163_v48 = vmul.f32 %v3616_v41, %v2133_v42  ;;  %v2165_v46 = vmul.f32 %v3620_v52, %v2142_v0  ;;  %v2546_v6 = vpop.eup %2545 }
 0x405   :  { %v2149_v27 = vadd.f32 %v2148_v55, %v2147_v12  ;;  %v2185_v45 = vsel %vm2184_vm9, %v2163_v48, %v2183_v2 }
 0x406   :  { %v2187_v5 = vsel %vm2186_vm1, %v2165_v46, %v2185_v45 }
 0x407   :  { %v2150_v18 = vrot.slane %v2149_v27, 1 }
 0x409   :  { %v2151_v51 = vadd.f32 %v2150_v18, %v2149_v27 }
 0x40b   :  { %v2167_v32 = vmul.f32 %v2546_v6, %v2151_v51 }
 0x40d   :  { %v2189_v38 = vsel %vm2188_vm12, %v2167_v32, %v2187_v5 }
 0x40e   :  { %2191 = vst.msk [vmem:[#allocation2] sm:$0xff] %vm413_vm13, %v2189_v38 }
 0x40f   :  { %2558 = shalt.err (!%p2555_p4)
}
 0x410   :  { %2201 = dma.vmem_to_hbm [thread:$0]  %s2199_s26, 128, %s3664_s6, [#allocation3]  }
 0x411   :  { %2567 = dma.done.wait [#allocation3], 128  }
 0x412   :  { %2568 = vsyncadd [#allocation3], 4294967168 }
 0x413   :  { %2205 = vsyncpa [#allocation3], 1 }

</bundles_post_ra>
